<compile_context>
chip_gen: v6e
topology: v6e:2x2x1
jax: 0.10.0
libtpu: 0.0.40
codegen_flags: <defaults>
</compile_context>

<pallas_src>
import jax
import jax.numpy as jnp
import numpy as np
from jax.experimental import pallas as pl
from jax.experimental.pallas import tpu as pltpu


# ----------------------------------------------------------------------------
# Pallas kernel: fused (Conv1d -> ReLU -> BN_eval) x 3 for ONE batch element,
# channels-first layout.
# ----------------------------------------------------------------------------
def _protein_cnn_kernel(v_ref,
                        w1_ref, p1_ref, w2_ref, p2_ref, w3_ref, p3_ref,
                        o_ref):
    """
    v_ref : (E, L)          input, channels-first (sequence on the lane axis)
    wX_ref: (k, Cout, Cin)  conv weight taps, pre-transposed for dot(w, x)
    pX_ref: (Cout, 3)       col 0 = conv bias, col 1 = BN scale, col 2 = BN shift
    o_ref : (C3, L3)        channels-first output (PyTorch `.view` == reshape)
    """

    def conv_relu_bn(x, w_ref, p_ref):
        k = w_ref.shape[0]
        c_out = w_ref.shape[1]
        l_out = x.shape[1] - k + 1              # VALID convolution
        p = p_ref[...]                          # (Cout, 3)

        acc = jnp.zeros((c_out, l_out), jnp.float32)
        # Static unroll over the (small) kernel taps: each tap is one MXU push.
        for j in range(k):
            acc = acc + jnp.dot(w_ref[j], x[:, j:j + l_out],
                                preferred_element_type=jnp.float32)

        y = acc + p[:, 0:1]                     # conv bias (per channel)
        r = jnp.maximum(y, 0.0)                 # ReLU
        return r * p[:, 1:2] + p[:, 2:3]        # folded eval-mode BatchNorm1d

    x = v_ref[...].astype(jnp.float32)          # (E, L)
    x = conv_relu_bn(x, w1_ref, p1_ref)         # (C1, L1)
    x = conv_relu_bn(x, w2_ref, p2_ref)         # (C2, L2)
    x = conv_relu_bn(x, w3_ref, p3_ref)         # (C3, L3)
    o_ref[...] = x.astype(o_ref.dtype)


# ----------------------------------------------------------------------------
# Wrapper: layout prep + pallas_call + the module's final `.view`
# ----------------------------------------------------------------------------
def protein_cnn_forward(v, params, *, eps=1e-5):
    """v: (B, L, E) float32; params: list of 3 layer dicts (PyTorch layouts).

    Each layer dict: w (Cout, Cin, k), b/gamma/beta/mean/var (Cout,).
    Returns (B, L3, C3), replicating `v.view(B, v.size(2), -1)`.
    """
    B, L, E = v.shape

    # channels-first, exactly like `v.transpose(2, 1)` in the module
    v_cf = jnp.swapaxes(v, 1, 2)                           # (B, E, L)

    kern_ws, kern_ps = [], []
    l_cur, c_cur = L, E
    for p in params:
        w = p["w"]                                         # (Cout, Cin, k)
        c_out, c_in, k = w.shape
        assert c_in == c_cur
        kern_ws.append(jnp.transpose(w, (2, 0, 1)))        # (k, Cout, Cin)
        scale = p["gamma"] / jnp.sqrt(p["var"] + eps)      # eval-mode BN fold
        shift = p["beta"] - p["mean"] * scale
        kern_ps.append(jnp.stack([p["b"], scale, shift], axis=1))  # (Cout, 3)
        l_cur = l_cur - k + 1
        c_cur = c_out
    L3, C3 = l_cur, c_cur
    assert L3 > 0, "sequence too short for the given kernel sizes"

    in_specs = [pl.BlockSpec((None, E, L), lambda b: (b, 0, 0))]
    operands = [v_cf]
    for w, pp in zip(kern_ws, kern_ps):
        in_specs.append(pl.BlockSpec(w.shape, lambda b: (0, 0, 0)))
        in_specs.append(pl.BlockSpec(pp.shape, lambda b: (0, 0)))
        operands.extend([w, pp])

    out_cf = pl.pallas_call(
        _protein_cnn_kernel,
        out_shape=jax.ShapeDtypeStruct((B, C3, L3), v.dtype),
        grid=(B,),
        in_specs=in_specs,
        out_specs=pl.BlockSpec((None, C3, L3), lambda b: (b, 0, 0)),
        compiler_params=pltpu.CompilerParams(
            dimension_semantics=("parallel",)),
    )(*operands)

    # (B, C3, L3) contiguous -> view(B, L3, C3): matches the module's
    # `v.view(v.size(0), v.size(2), -1)` (a memory reinterpretation, NOT a
    # transpose), so a plain row-major reshape is exact.
    return out_cf.reshape(B, L3, C3)


# ----------------------------------------------------------------------------
# Deterministic synthetic parameters (PyTorch layouts)
# ----------------------------------------------------------------------------
def init_protein_cnn_params(key, embedding_dim, num_filters, kernel_size):
    in_ch = [embedding_dim] + list(num_filters)
    params = []
    for i in range(3):
        c_in, c_out, k = in_ch[i], in_ch[i + 1], kernel_size[i]
        key, kw, kb, kg, kbt, km, kv = jax.random.split(key, 7)
        params.append(dict(
            w=jax.random.normal(kw, (c_out, c_in, k), jnp.float32)
              / np.sqrt(c_in * k),
            b=0.1 * jax.random.normal(kb, (c_out,), jnp.float32),
            gamma=1.0 + 0.1 * jax.random.normal(kg, (c_out,), jnp.float32),
            beta=0.1 * jax.random.normal(kbt, (c_out,), jnp.float32),
            mean=0.1 * jax.random.normal(km, (c_out,), jnp.float32),
            var=0.5 + jnp.abs(jax.random.normal(kv, (c_out,), jnp.float32)),
        ))
    return params


# ----------------------------------------------------------------------------
# Pure-JAX reference following PyTorch semantics exactly (for correctness)
# ----------------------------------------------------------------------------
def protein_cnn_reference(v, params, eps=1e-5):
    x = jnp.swapaxes(v, 1, 2)                              # (B, E, L)
    for p in params:
        y = jax.lax.conv_general_dilated(
            x, p["w"], window_strides=(1,), padding="VALID",
            dimension_numbers=("NCH", "OIH", "NCH"),
            precision=jax.lax.Precision.HIGHEST)
        y = y + p["b"][None, :, None]
        r = jnp.maximum(y, 0.0)
        x = ((r - p["mean"][None, :, None])
             / jnp.sqrt(p["var"] + eps)[None, :, None]
             * p["gamma"][None, :, None] + p["beta"][None, :, None])
    B, C3, L3 = x.shape
    return x.reshape(B, L3, C3)                            # PyTorch `.view`


if __name__ == "__main__":
    # Small shapes consistent with the module: B=2, seq=32, embedding_dim=32,
    # num_filters=[32, 64, 96], kernel_size=[3, 5, 7]  ->  output (2, 20, 96)
    B, L, E = 2, 32, 32
    num_filters = [32, 64, 96]
    kernel_size = [3, 5, 7]

    key = jax.random.PRNGKey(0)
    k_v, k_p = jax.random.split(key)
    v = jax.random.normal(k_v, (B, L, E), jnp.float32)
    params = init_protein_cnn_params(k_p, E, num_filters, kernel_size)

    out = protein_cnn_forward(v, params)
    jax.block_until_ready(out)

    ref = protein_cnn_reference(v, params)
    np.testing.assert_allclose(np.asarray(out), np.asarray(ref),
                               rtol=1e-3, atol=1e-3)

    print("KERNEL_OK")
</pallas_src>

<mosaic_0001>
module attributes {stable_mosaic.version = 11 : i64} {
  func.func @_protein_cnn_kernel(%arg0: i32, %arg1: memref<1x32x32xf32, #tpu.memory_space<vmem>>, %arg2: memref<3x32x32xf32, #tpu.memory_space<vmem>>, %arg3: memref<32x3xf32, #tpu.memory_space<vmem>>, %arg4: memref<5x64x32xf32, #tpu.memory_space<vmem>>, %arg5: memref<64x3xf32, #tpu.memory_space<vmem>>, %arg6: memref<7x96x64xf32, #tpu.memory_space<vmem>>, %arg7: memref<96x3xf32, #tpu.memory_space<vmem>>, %arg8: memref<1x96x20xf32, #tpu.memory_space<vmem>>) attributes {dimension_semantics = [#tpu.dimension_semantics<parallel>], iteration_bounds = array<i64: 2>, scalar_prefetch = 0 : i64, scratch_operands = 0 : i64, tpu.core_type = #tpu.core_type<tc>, window_params = [{transform_indices = @transform_0, window_bounds = array<i64: 1, 32, 32>}, {pipeline_mode = #tpu.pipeline_mode<synchronous>, transform_indices = @transform_1, window_bounds = array<i64: 3, 32, 32>}, {pipeline_mode = #tpu.pipeline_mode<synchronous>, transform_indices = @transform_2, window_bounds = array<i64: 32, 3>}, {pipeline_mode = #tpu.pipeline_mode<synchronous>, transform_indices = @transform_3, window_bounds = array<i64: 5, 64, 32>}, {pipeline_mode = #tpu.pipeline_mode<synchronous>, transform_indices = @transform_4, window_bounds = array<i64: 64, 3>}, {pipeline_mode = #tpu.pipeline_mode<synchronous>, transform_indices = @transform_5, window_bounds = array<i64: 7, 96, 64>}, {pipeline_mode = #tpu.pipeline_mode<synchronous>, transform_indices = @transform_6, window_bounds = array<i64: 96, 3>}, {transform_indices = @transform_7, window_bounds = array<i64: 1, 96, 20>}]} {
    %c0 = arith.constant 0 : index
    %c0_0 = arith.constant 0 : index
    %c0_1 = arith.constant 0 : index
    %0 = vector.load %arg1[%c0, %c0_0, %c0_1] : memref<1x32x32xf32, #tpu.memory_space<vmem>>, vector<1x32x32xf32>
    %1 = vector.shape_cast %0 : vector<1x32x32xf32> to vector<32x32xf32>
    %c0_2 = arith.constant 0 : index
    %c0_3 = arith.constant 0 : index
    %2 = vector.load %arg3[%c0_2, %c0_3] : memref<32x3xf32, #tpu.memory_space<vmem>>, vector<32x3xf32>
    %cst = arith.constant 0.000000e+00 : f32
    %3 = vector.broadcast %cst : f32 to vector<32x30xf32>
    %c0_4 = arith.constant 0 : index
    %c0_5 = arith.constant 0 : index
    %c0_6 = arith.constant 0 : index
    %4 = vector.load %arg2[%c0_4, %c0_5, %c0_6] : memref<3x32x32xf32, #tpu.memory_space<vmem>>, vector<1x32x32xf32>
    %5 = vector.shape_cast %4 : vector<1x32x32xf32> to vector<32x32xf32>
    %6 = vector.extract_strided_slice %1 {offsets = [0, 0], sizes = [32, 30], strides = [1, 1]} : vector<32x32xf32> to vector<32x30xf32>
    %cst_7 = arith.constant dense<0.000000e+00> : vector<32x30xf32>
    %7 = tpu.matmul %5, %6, %cst_7 {dimension_numbers = #tpu.dot_dimension_numbers<[1], [0], [0], [1], [0, 0, 1, 1], [], []>} : vector<32x32xf32>, vector<32x30xf32>, vector<32x30xf32> -> vector<32x30xf32>
    %8 = arith.addf %3, %7 : vector<32x30xf32>
    %c1 = arith.constant 1 : index
    %c0_8 = arith.constant 0 : index
    %c0_9 = arith.constant 0 : index
    %9 = vector.load %arg2[%c1, %c0_8, %c0_9] : memref<3x32x32xf32, #tpu.memory_space<vmem>>, vector<1x32x32xf32>
    %10 = vector.shape_cast %9 : vector<1x32x32xf32> to vector<32x32xf32>
    %11 = vector.extract_strided_slice %1 {offsets = [0, 1], sizes = [32, 30], strides = [1, 1]} : vector<32x32xf32> to vector<32x30xf32>
    %cst_10 = arith.constant dense<0.000000e+00> : vector<32x30xf32>
    %12 = tpu.matmul %10, %11, %cst_10 {dimension_numbers = #tpu.dot_dimension_numbers<[1], [0], [0], [1], [0, 0, 1, 1], [], []>} : vector<32x32xf32>, vector<32x30xf32>, vector<32x30xf32> -> vector<32x30xf32>
    %13 = arith.addf %8, %12 : vector<32x30xf32>
    %c2 = arith.constant 2 : index
    %c0_11 = arith.constant 0 : index
    %c0_12 = arith.constant 0 : index
    %14 = vector.load %arg2[%c2, %c0_11, %c0_12] : memref<3x32x32xf32, #tpu.memory_space<vmem>>, vector<1x32x32xf32>
    %15 = vector.shape_cast %14 : vector<1x32x32xf32> to vector<32x32xf32>
    %16 = vector.extract_strided_slice %1 {offsets = [0, 2], sizes = [32, 30], strides = [1, 1]} : vector<32x32xf32> to vector<32x30xf32>
    %cst_13 = arith.constant dense<0.000000e+00> : vector<32x30xf32>
    %17 = tpu.matmul %15, %16, %cst_13 {dimension_numbers = #tpu.dot_dimension_numbers<[1], [0], [0], [1], [0, 0, 1, 1], [], []>} : vector<32x32xf32>, vector<32x30xf32>, vector<32x30xf32> -> vector<32x30xf32>
    %18 = arith.addf %13, %17 : vector<32x30xf32>
    %19 = vector.extract_strided_slice %2 {offsets = [0, 0], sizes = [32, 1], strides = [1, 1]} : vector<32x3xf32> to vector<32x1xf32>
    %20 = vector.broadcast %19 : vector<32x1xf32> to vector<32x30xf32>
    %21 = arith.addf %18, %20 : vector<32x30xf32>
    %cst_14 = arith.constant 0.000000e+00 : f32
    %22 = vector.broadcast %cst_14 : f32 to vector<32x30xf32>
    %23 = arith.maximumf %21, %22 : vector<32x30xf32>
    %24 = vector.extract_strided_slice %2 {offsets = [0, 1], sizes = [32, 1], strides = [1, 1]} : vector<32x3xf32> to vector<32x1xf32>
    %25 = vector.broadcast %24 : vector<32x1xf32> to vector<32x30xf32>
    %26 = arith.mulf %23, %25 : vector<32x30xf32>
    %27 = vector.extract_strided_slice %2 {offsets = [0, 2], sizes = [32, 1], strides = [1, 1]} : vector<32x3xf32> to vector<32x1xf32>
    %28 = vector.broadcast %27 : vector<32x1xf32> to vector<32x30xf32>
    %29 = arith.addf %26, %28 : vector<32x30xf32>
    %c0_15 = arith.constant 0 : index
    %c0_16 = arith.constant 0 : index
    %30 = vector.load %arg5[%c0_15, %c0_16] : memref<64x3xf32, #tpu.memory_space<vmem>>, vector<64x3xf32>
    %cst_17 = arith.constant 0.000000e+00 : f32
    %31 = vector.broadcast %cst_17 : f32 to vector<64x26xf32>
    %c0_18 = arith.constant 0 : index
    %c0_19 = arith.constant 0 : index
    %c0_20 = arith.constant 0 : index
    %32 = vector.load %arg4[%c0_18, %c0_19, %c0_20] : memref<5x64x32xf32, #tpu.memory_space<vmem>>, vector<1x64x32xf32>
    %33 = vector.shape_cast %32 : vector<1x64x32xf32> to vector<64x32xf32>
    %34 = vector.extract_strided_slice %29 {offsets = [0, 0], sizes = [32, 26], strides = [1, 1]} : vector<32x30xf32> to vector<32x26xf32>
    %cst_21 = arith.constant dense<0.000000e+00> : vector<64x26xf32>
    %35 = tpu.matmul %33, %34, %cst_21 {dimension_numbers = #tpu.dot_dimension_numbers<[1], [0], [0], [1], [0, 0, 1, 1], [], []>} : vector<64x32xf32>, vector<32x26xf32>, vector<64x26xf32> -> vector<64x26xf32>
    %36 = arith.addf %31, %35 : vector<64x26xf32>
    %c1_22 = arith.constant 1 : index
    %c0_23 = arith.constant 0 : index
    %c0_24 = arith.constant 0 : index
    %37 = vector.load %arg4[%c1_22, %c0_23, %c0_24] : memref<5x64x32xf32, #tpu.memory_space<vmem>>, vector<1x64x32xf32>
    %38 = vector.shape_cast %37 : vector<1x64x32xf32> to vector<64x32xf32>
    %39 = vector.extract_strided_slice %29 {offsets = [0, 1], sizes = [32, 26], strides = [1, 1]} : vector<32x30xf32> to vector<32x26xf32>
    %cst_25 = arith.constant dense<0.000000e+00> : vector<64x26xf32>
    %40 = tpu.matmul %38, %39, %cst_25 {dimension_numbers = #tpu.dot_dimension_numbers<[1], [0], [0], [1], [0, 0, 1, 1], [], []>} : vector<64x32xf32>, vector<32x26xf32>, vector<64x26xf32> -> vector<64x26xf32>
    %41 = arith.addf %36, %40 : vector<64x26xf32>
    %c2_26 = arith.constant 2 : index
    %c0_27 = arith.constant 0 : index
    %c0_28 = arith.constant 0 : index
    %42 = vector.load %arg4[%c2_26, %c0_27, %c0_28] : memref<5x64x32xf32, #tpu.memory_space<vmem>>, vector<1x64x32xf32>
    %43 = vector.shape_cast %42 : vector<1x64x32xf32> to vector<64x32xf32>
    %44 = vector.extract_strided_slice %29 {offsets = [0, 2], sizes = [32, 26], strides = [1, 1]} : vector<32x30xf32> to vector<32x26xf32>
    %cst_29 = arith.constant dense<0.000000e+00> : vector<64x26xf32>
    %45 = tpu.matmul %43, %44, %cst_29 {dimension_numbers = #tpu.dot_dimension_numbers<[1], [0], [0], [1], [0, 0, 1, 1], [], []>} : vector<64x32xf32>, vector<32x26xf32>, vector<64x26xf32> -> vector<64x26xf32>
    %46 = arith.addf %41, %45 : vector<64x26xf32>
    %c3 = arith.constant 3 : index
    %c0_30 = arith.constant 0 : index
    %c0_31 = arith.constant 0 : index
    %47 = vector.load %arg4[%c3, %c0_30, %c0_31] : memref<5x64x32xf32, #tpu.memory_space<vmem>>, vector<1x64x32xf32>
    %48 = vector.shape_cast %47 : vector<1x64x32xf32> to vector<64x32xf32>
    %49 = vector.extract_strided_slice %29 {offsets = [0, 3], sizes = [32, 26], strides = [1, 1]} : vector<32x30xf32> to vector<32x26xf32>
    %cst_32 = arith.constant dense<0.000000e+00> : vector<64x26xf32>
    %50 = tpu.matmul %48, %49, %cst_32 {dimension_numbers = #tpu.dot_dimension_numbers<[1], [0], [0], [1], [0, 0, 1, 1], [], []>} : vector<64x32xf32>, vector<32x26xf32>, vector<64x26xf32> -> vector<64x26xf32>
    %51 = arith.addf %46, %50 : vector<64x26xf32>
    %c4 = arith.constant 4 : index
    %c0_33 = arith.constant 0 : index
    %c0_34 = arith.constant 0 : index
    %52 = vector.load %arg4[%c4, %c0_33, %c0_34] : memref<5x64x32xf32, #tpu.memory_space<vmem>>, vector<1x64x32xf32>
    %53 = vector.shape_cast %52 : vector<1x64x32xf32> to vector<64x32xf32>
    %54 = vector.extract_strided_slice %29 {offsets = [0, 4], sizes = [32, 26], strides = [1, 1]} : vector<32x30xf32> to vector<32x26xf32>
    %cst_35 = arith.constant dense<0.000000e+00> : vector<64x26xf32>
    %55 = tpu.matmul %53, %54, %cst_35 {dimension_numbers = #tpu.dot_dimension_numbers<[1], [0], [0], [1], [0, 0, 1, 1], [], []>} : vector<64x32xf32>, vector<32x26xf32>, vector<64x26xf32> -> vector<64x26xf32>
    %56 = arith.addf %51, %55 : vector<64x26xf32>
    %57 = vector.extract_strided_slice %30 {offsets = [0, 0], sizes = [64, 1], strides = [1, 1]} : vector<64x3xf32> to vector<64x1xf32>
    %58 = vector.broadcast %57 : vector<64x1xf32> to vector<64x26xf32>
    %59 = arith.addf %56, %58 : vector<64x26xf32>
    %cst_36 = arith.constant 0.000000e+00 : f32
    %60 = vector.broadcast %cst_36 : f32 to vector<64x26xf32>
    %61 = arith.maximumf %59, %60 : vector<64x26xf32>
    %62 = vector.extract_strided_slice %30 {offsets = [0, 1], sizes = [64, 1], strides = [1, 1]} : vector<64x3xf32> to vector<64x1xf32>
    %63 = vector.broadcast %62 : vector<64x1xf32> to vector<64x26xf32>
    %64 = arith.mulf %61, %63 : vector<64x26xf32>
    %65 = vector.extract_strided_slice %30 {offsets = [0, 2], sizes = [64, 1], strides = [1, 1]} : vector<64x3xf32> to vector<64x1xf32>
    %66 = vector.broadcast %65 : vector<64x1xf32> to vector<64x26xf32>
    %67 = arith.addf %64, %66 : vector<64x26xf32>
    %c0_37 = arith.constant 0 : index
    %c0_38 = arith.constant 0 : index
    %68 = vector.load %arg7[%c0_37, %c0_38] : memref<96x3xf32, #tpu.memory_space<vmem>>, vector<96x3xf32>
    %cst_39 = arith.constant 0.000000e+00 : f32
    %69 = vector.broadcast %cst_39 : f32 to vector<96x20xf32>
    %c0_40 = arith.constant 0 : index
    %c0_41 = arith.constant 0 : index
    %c0_42 = arith.constant 0 : index
    %70 = vector.load %arg6[%c0_40, %c0_41, %c0_42] : memref<7x96x64xf32, #tpu.memory_space<vmem>>, vector<1x96x64xf32>
    %71 = vector.shape_cast %70 : vector<1x96x64xf32> to vector<96x64xf32>
    %72 = vector.extract_strided_slice %67 {offsets = [0, 0], sizes = [64, 20], strides = [1, 1]} : vector<64x26xf32> to vector<64x20xf32>
    %cst_43 = arith.constant dense<0.000000e+00> : vector<96x20xf32>
    %73 = tpu.matmul %71, %72, %cst_43 {dimension_numbers = #tpu.dot_dimension_numbers<[1], [0], [0], [1], [0, 0, 1, 1], [], []>} : vector<96x64xf32>, vector<64x20xf32>, vector<96x20xf32> -> vector<96x20xf32>
    %74 = arith.addf %69, %73 : vector<96x20xf32>
    %c1_44 = arith.constant 1 : index
    %c0_45 = arith.constant 0 : index
    %c0_46 = arith.constant 0 : index
    %75 = vector.load %arg6[%c1_44, %c0_45, %c0_46] : memref<7x96x64xf32, #tpu.memory_space<vmem>>, vector<1x96x64xf32>
    %76 = vector.shape_cast %75 : vector<1x96x64xf32> to vector<96x64xf32>
    %77 = vector.extract_strided_slice %67 {offsets = [0, 1], sizes = [64, 20], strides = [1, 1]} : vector<64x26xf32> to vector<64x20xf32>
    %cst_47 = arith.constant dense<0.000000e+00> : vector<96x20xf32>
    %78 = tpu.matmul %76, %77, %cst_47 {dimension_numbers = #tpu.dot_dimension_numbers<[1], [0], [0], [1], [0, 0, 1, 1], [], []>} : vector<96x64xf32>, vector<64x20xf32>, vector<96x20xf32> -> vector<96x20xf32>
    %79 = arith.addf %74, %78 : vector<96x20xf32>
    %c2_48 = arith.constant 2 : index
    %c0_49 = arith.constant 0 : index
    %c0_50 = arith.constant 0 : index
    %80 = vector.load %arg6[%c2_48, %c0_49, %c0_50] : memref<7x96x64xf32, #tpu.memory_space<vmem>>, vector<1x96x64xf32>
    %81 = vector.shape_cast %80 : vector<1x96x64xf32> to vector<96x64xf32>
    %82 = vector.extract_strided_slice %67 {offsets = [0, 2], sizes = [64, 20], strides = [1, 1]} : vector<64x26xf32> to vector<64x20xf32>
    %cst_51 = arith.constant dense<0.000000e+00> : vector<96x20xf32>
    %83 = tpu.matmul %81, %82, %cst_51 {dimension_numbers = #tpu.dot_dimension_numbers<[1], [0], [0], [1], [0, 0, 1, 1], [], []>} : vector<96x64xf32>, vector<64x20xf32>, vector<96x20xf32> -> vector<96x20xf32>
    %84 = arith.addf %79, %83 : vector<96x20xf32>
    %c3_52 = arith.constant 3 : index
    %c0_53 = arith.constant 0 : index
    %c0_54 = arith.constant 0 : index
    %85 = vector.load %arg6[%c3_52, %c0_53, %c0_54] : memref<7x96x64xf32, #tpu.memory_space<vmem>>, vector<1x96x64xf32>
    %86 = vector.shape_cast %85 : vector<1x96x64xf32> to vector<96x64xf32>
    %87 = vector.extract_strided_slice %67 {offsets = [0, 3], sizes = [64, 20], strides = [1, 1]} : vector<64x26xf32> to vector<64x20xf32>
    %cst_55 = arith.constant dense<0.000000e+00> : vector<96x20xf32>
    %88 = tpu.matmul %86, %87, %cst_55 {dimension_numbers = #tpu.dot_dimension_numbers<[1], [0], [0], [1], [0, 0, 1, 1], [], []>} : vector<96x64xf32>, vector<64x20xf32>, vector<96x20xf32> -> vector<96x20xf32>
    %89 = arith.addf %84, %88 : vector<96x20xf32>
    %c4_56 = arith.constant 4 : index
    %c0_57 = arith.constant 0 : index
    %c0_58 = arith.constant 0 : index
    %90 = vector.load %arg6[%c4_56, %c0_57, %c0_58] : memref<7x96x64xf32, #tpu.memory_space<vmem>>, vector<1x96x64xf32>
    %91 = vector.shape_cast %90 : vector<1x96x64xf32> to vector<96x64xf32>
    %92 = vector.extract_strided_slice %67 {offsets = [0, 4], sizes = [64, 20], strides = [1, 1]} : vector<64x26xf32> to vector<64x20xf32>
    %cst_59 = arith.constant dense<0.000000e+00> : vector<96x20xf32>
    %93 = tpu.matmul %91, %92, %cst_59 {dimension_numbers = #tpu.dot_dimension_numbers<[1], [0], [0], [1], [0, 0, 1, 1], [], []>} : vector<96x64xf32>, vector<64x20xf32>, vector<96x20xf32> -> vector<96x20xf32>
    %94 = arith.addf %89, %93 : vector<96x20xf32>
    %c5 = arith.constant 5 : index
    %c0_60 = arith.constant 0 : index
    %c0_61 = arith.constant 0 : index
    %95 = vector.load %arg6[%c5, %c0_60, %c0_61] : memref<7x96x64xf32, #tpu.memory_space<vmem>>, vector<1x96x64xf32>
    %96 = vector.shape_cast %95 : vector<1x96x64xf32> to vector<96x64xf32>
    %97 = vector.extract_strided_slice %67 {offsets = [0, 5], sizes = [64, 20], strides = [1, 1]} : vector<64x26xf32> to vector<64x20xf32>
    %cst_62 = arith.constant dense<0.000000e+00> : vector<96x20xf32>
    %98 = tpu.matmul %96, %97, %cst_62 {dimension_numbers = #tpu.dot_dimension_numbers<[1], [0], [0], [1], [0, 0, 1, 1], [], []>} : vector<96x64xf32>, vector<64x20xf32>, vector<96x20xf32> -> vector<96x20xf32>
    %99 = arith.addf %94, %98 : vector<96x20xf32>
    %c6 = arith.constant 6 : index
    %c0_63 = arith.constant 0 : index
    %c0_64 = arith.constant 0 : index
    %100 = vector.load %arg6[%c6, %c0_63, %c0_64] : memref<7x96x64xf32, #tpu.memory_space<vmem>>, vector<1x96x64xf32>
    %101 = vector.shape_cast %100 : vector<1x96x64xf32> to vector<96x64xf32>
    %102 = vector.extract_strided_slice %67 {offsets = [0, 6], sizes = [64, 20], strides = [1, 1]} : vector<64x26xf32> to vector<64x20xf32>
    %cst_65 = arith.constant dense<0.000000e+00> : vector<96x20xf32>
    %103 = tpu.matmul %101, %102, %cst_65 {dimension_numbers = #tpu.dot_dimension_numbers<[1], [0], [0], [1], [0, 0, 1, 1], [], []>} : vector<96x64xf32>, vector<64x20xf32>, vector<96x20xf32> -> vector<96x20xf32>
    %104 = arith.addf %99, %103 : vector<96x20xf32>
    %105 = vector.extract_strided_slice %68 {offsets = [0, 0], sizes = [96, 1], strides = [1, 1]} : vector<96x3xf32> to vector<96x1xf32>
    %106 = vector.broadcast %105 : vector<96x1xf32> to vector<96x20xf32>
    %107 = arith.addf %104, %106 : vector<96x20xf32>
    %cst_66 = arith.constant 0.000000e+00 : f32
    %108 = vector.broadcast %cst_66 : f32 to vector<96x20xf32>
    %109 = arith.maximumf %107, %108 : vector<96x20xf32>
    %110 = vector.extract_strided_slice %68 {offsets = [0, 1], sizes = [96, 1], strides = [1, 1]} : vector<96x3xf32> to vector<96x1xf32>
    %111 = vector.broadcast %110 : vector<96x1xf32> to vector<96x20xf32>
    %112 = arith.mulf %109, %111 : vector<96x20xf32>
    %113 = vector.extract_strided_slice %68 {offsets = [0, 2], sizes = [96, 1], strides = [1, 1]} : vector<96x3xf32> to vector<96x1xf32>
    %114 = vector.broadcast %113 : vector<96x1xf32> to vector<96x20xf32>
    %115 = arith.addf %112, %114 : vector<96x20xf32>
    %c0_67 = arith.constant 0 : index
    %c0_68 = arith.constant 0 : index
    %c0_69 = arith.constant 0 : index
    %116 = vector.load %arg8[%c0_67, %c0_68, %c0_69] : memref<1x96x20xf32, #tpu.memory_space<vmem>>, vector<1x96x20xf32>
    %117 = vector.shape_cast %116 : vector<1x96x20xf32> to vector<96x20xf32>
    %118 = vector.shape_cast %115 : vector<96x20xf32> to vector<1x96x20xf32>
    tpu.vector_store %arg8[%c0_67, %c0_68, %c0_69], %118 {strides = array<i32>} : memref<1x96x20xf32, #tpu.memory_space<vmem>>, vector<1x96x20xf32>,
    return
  }
  func.func @transform_0(%arg0: i32) -> (i32, i32, i32) {
    %c0_i32 = arith.constant 0 : i32
    %c0_i32_0 = arith.constant 0 : i32
    %c0_i32_1 = arith.constant 0 : i32
    return %arg0, %c0_i32, %c0_i32_0 : i32, i32, i32
  }
  func.func @transform_1(%arg0: i32) -> (i32, i32, i32) {
    %c0_i32 = arith.constant 0 : i32
    %c0_i32_0 = arith.constant 0 : i32
    %c0_i32_1 = arith.constant 0 : i32
    %c0_i32_2 = arith.constant 0 : i32
    return %c0_i32, %c0_i32_0, %c0_i32_1 : i32, i32, i32
  }
  func.func @transform_2(%arg0: i32) -> (i32, i32) {
    %c0_i32 = arith.constant 0 : i32
    %c0_i32_0 = arith.constant 0 : i32
    %c0_i32_1 = arith.constant 0 : i32
    return %c0_i32, %c0_i32_0 : i32, i32
  }
  func.func @transform_3(%arg0: i32) -> (i32, i32, i32) {
    %c0_i32 = arith.constant 0 : i32
    %c0_i32_0 = arith.constant 0 : i32
    %c0_i32_1 = arith.constant 0 : i32
    %c0_i32_2 = arith.constant 0 : i32
    return %c0_i32, %c0_i32_0, %c0_i32_1 : i32, i32, i32
  }
  func.func @transform_4(%arg0: i32) -> (i32, i32) {
    %c0_i32 = arith.constant 0 : i32
    %c0_i32_0 = arith.constant 0 : i32
    %c0_i32_1 = arith.constant 0 : i32
    return %c0_i32, %c0_i32_0 : i32, i32
  }
  func.func @transform_5(%arg0: i32) -> (i32, i32, i32) {
    %c0_i32 = arith.constant 0 : i32
    %c0_i32_0 = arith.constant 0 : i32
    %c0_i32_1 = arith.constant 0 : i32
    %c0_i32_2 = arith.constant 0 : i32
    return %c0_i32, %c0_i32_0, %c0_i32_1 : i32, i32, i32
  }
  func.func @transform_6(%arg0: i32) -> (i32, i32) {
    %c0_i32 = arith.constant 0 : i32
    %c0_i32_0 = arith.constant 0 : i32
    %c0_i32_1 = arith.constant 0 : i32
    return %c0_i32, %c0_i32_0 : i32, i32
  }
  func.func @transform_7(%arg0: i32) -> (i32, i32, i32) {
    %c0_i32 = arith.constant 0 : i32
    %c0_i32_0 = arith.constant 0 : i32
    %c0_i32_1 = arith.constant 0 : i32
    return %arg0, %c0_i32, %c0_i32_0 : i32, i32, i32
  }
}

</mosaic_0001>

<bundles_post_ra>
// kernel: tpu_custom_call.1
= control target key start
LH: loop header
LB: loop body
LE: loop exit
PB: predicated region body
PF: predicated region fallthrough
CT: control target
= control target key end

     0   :  { %s4283_s24 = smov 0   ;;  %s5476_s0 = inlined_call_operand.vmem [shape: f32[2,32,32], index: 0, kind: input, shape index: {}]   ;;  %s5477_s1 = inlined_call_operand.vmem [shape: f32[3,32,32], index: 1, kind: input, shape index: {}]   ;;  %s5478_s2 = inlined_call_operand.vmem [shape: f32[32,3], index: 2, kind: input, shape index: {}]   ;;  %s5479_s3 = inlined_call_operand.vmem [shape: f32[5,64,32], index: 3, kind: input, shape index: {}]   ;;  %s5480_s4 = inlined_call_operand.vmem [shape: f32[64,3], index: 4, kind: input, shape index: {}]   ;;  %s5481_s5 = inlined_call_operand.vmem [shape: f32[7,96,64], index: 5, kind: input, shape index: {}]   ;;  %s5482_s6 = inlined_call_operand.vmem [shape: f32[96,3], index: 6, kind: input, shape index: {}]   ;;  %s5483_s7 = inlined_call_operand.vmem [shape: f32[2,96,20], index: 7, kind: output, shape index: {}]  }
   0x1 LB: > { %s3316_s25 = sadd.s32 4294967295, %s4232_s24   ;;  %p3320_p0 = scmp.ge.s32.totalorder %s4232_s24, 1  ;;  %s4232_s24 = sphi %s4283_s24, %s17_s24  }
   0x2   : > { %p237_p1 = scmp.lt.s32.totalorder %s4232_s24, 3 }
   0x4   : > { %p238_p2 = pnand %p3320_p0, %p237_p1 }
   0x6   : > { %241 = sbr.rel (%p238_p2) target bundleno = 1168 (0x490), region = 48 }
   0xb   : > { %p269_p3 = scmp.lt.s32.totalorder %s3316_s25, 1  ;;  %v3324_v0 = vld [vmem:[%s5477_s1 + $0x20] sm:$0xff]  ;;  %vm312_vm0 = vcmask 261120   ;;  %s4234_s9 = smov 127   ;;  %v4236_v6 = vmov 0   ;;  %v285_v7 = vld [vmem:[%s5478_s2 + $0x10] sm:$0xff] }
   0xc   : > { %3807 = vmatprep.mubr.msk.f32.mxu1 %vm312_vm0, %v3324_v0  ;;  %v3336_v5 = vld [vmem:[%s5477_s1 + $0x40] sm:$0xff]  ;;  %s4235_s12 = smov 126   ;;  %4198 = vset.pattern.permute.xlu1 %v4236_v6  ;;  %v286_v8 = vld [vmem:[%s5478_s2 + $0x18] sm:$0xff]  ;;  %v284_v9 = vld [vmem:[%s5478_s2 + $0x8] sm:$0xff]  ;;  %v5486_v10 = vmov 1   ;;  %v5484_v12 = vmov 2  }
   0xd   : > { %s5551_s25 = smov (!%p269_p3, %s3316_s25), 1  ;;  %3835 = vmatprep.mubr.msk.f32.mxu0 %vm312_vm0, %v3336_v5  ;;  %4197 = vset.pattern.permute.xlu0 %v4236_v6  ;;  %v283_v11 = vld [vmem:[%s5478_s2] sm:$0xff]  ;;  %v3325_v18 = vld [vmem:[%s5477_s1 + $0x28] sm:$0xff]  ;;  %v3326_v20 = vld [vmem:[%s5477_s1 + $0x30] sm:$0xff]  ;;  %s4239_s19 = smov 125   ;;  %vm1671_vm1 = vcmask 523264  }
   0xe   : > { %s3574_s28 = sshll.u32 %s5551_s25, 5  ;;  %v3327_v21 = vld [vmem:[%s5477_s1 + $0x38] sm:$0xff]  ;;  %v287_v24 = vld [vmem:[%s5477_s1] sm:$0xff]  ;;  %v288_v25 = vld [vmem:[%s5477_s1 + $0x8] sm:$0xff]  ;;  %s4240_s26 = smov 124   ;;  %vm3248_vm2 = vcmask 162816  }
   0xf   : > { %s273_s8 = scalar_lea.vmem %s5476_s0, %s3574_s28  ;;  %v3337_v26 = vld [vmem:[%s5477_s1 + $0x48] sm:$0xff]  ;;  %v289_v27 = vld [vmem:[%s5477_s1 + $0x10] sm:$0xff]  ;;  %v290_v29 = vld [vmem:[%s5477_s1 + $0x18] sm:$0xff]  ;;  %s4241_s23 = smov 123  }
  0x10   : > { %v4301_v1 = vld [vmem:[%s273_s8 + $0x18] sm:$0xff]  ;;  %v4303_v2 = vld [vmem:[%s273_s8 + $0x8] sm:$0xff]  ;;  %v4309_v3 = vld [vmem:[%s273_s8 + $0x10] sm:$0xff]  ;;  %s4242_s27 = smov 122   ;;  %s4179_s21 = smul.u32 96, %s5551_s25 }
  0x11   : > { %306 = vrot.lane.b32.xlu0 %v4301_v1, %s4234_s9  ;;  %302 = vrot.lane.b32.xlu1 %v4303_v2, %s4234_s9  ;;  %v4311_v4 = vld [vmem:[%s273_s8] sm:$0xff]  ;;  %v3338_v28 = vld [vmem:[%s5477_s1 + $0x50] sm:$0xff] }
  0x12   : > { %v3339_v30 = vld [vmem:[%s5477_s1 + $0x58] sm:$0xff]  ;;  %v3344_v63 = vld [vmem:[%s5479_s3 + $0x40] sm:$0xff] }
  0x13   : > { %v701_v0 = vld [vmem:[%s5479_s3] sm:$0xff] }
  0x15   : > { %304 = vrot.lane.b32.xlu0 %v4309_v3, %s4234_s9  ;;  %300 = vrot.lane.b32.xlu1 %v4311_v4, %s4234_s9 }
  0x19   : > { %518 = vrot.lane.b32.xlu0 %v4301_v1, %s4235_s12  ;;  %516 = vrot.lane.b32.xlu1 %v4309_v3, %s4235_s12 }
  0x1d   : > { %514 = vrot.lane.b32.xlu0 %v4303_v2, %s4235_s12  ;;  %512 = vrot.lane.b32.xlu1 %v4311_v4, %s4235_s12 }
  0x21   : > { %637 = vperm.xlu1 %4198, %v285_v7   ;;  %642 = vperm.xlu0 %4197, %v286_v8  }
  0x25   : > { %632 = vperm.xlu1 %4198, %v284_v9   ;;  %4199 = vset.pattern.permute.xlu0 %v5486_v10 }
  0x26   : > { %666 = vperm.xlu0 %4199, %v286_v8  }
  0x29   : > { %627 = vperm.xlu1 %4198, %v283_v11  }
  0x2a   : > { %4201 = vset.pattern.permute.xlu0 %v5484_v12 }
  0x2b   : > { %686 = vperm.xlu0 %4201, %v286_v8  }
  0x2d   : > { %4200 = vset.pattern.permute.xlu1 %v5486_v10 }
  0x2e   : > { %662 = vperm.xlu1 %4200, %v285_v7  }
  0x2f   : > { %4203 = vset.pattern.permute.xlu0 %v5486_v10 }
  0x30   : > { %654 = vperm.xlu0 %4203, %v283_v11  }
  0x32   : > { %658 = vperm.xlu1 %4200, %v284_v9  }
  0x34   : > { %4206 = vset.pattern.permute.xlu0 %v5484_v12 }
  0x36   : > { %4202 = vset.pattern.permute.xlu1 %v5484_v12 }
  0x37   : > { %682 = vperm.xlu1 %4202, %v285_v7  }
  0x3b   : > { %678 = vperm.xlu1 %4202, %v284_v9  }
  0x3f   : > { %674 = vperm.xlu1 %4202, %v283_v11  }
  0x43   : > { %4204 = vset.pattern.permute.xlu1 %v4236_v6 }
  0x83   : > { %v307_v13 = vpop.permute.xlu0 %306  ;;  %v303_v14 = vpop.permute.xlu1 %302 }
  0x84   : > { %3799 = vmatprep.subr.mxu1 %v307_v13 }
  0x85   : > { %3800 = vmatpush3.msra.mxu1 %v307_v13 }
  0x87   : > { %v305_v15 = vpop.permute.xlu0 %304  ;;  %v301_v16 = vpop.permute.xlu1 %300 }
  0x88   : > { %3801 = vmatprep.subr.mxu1 %v305_v15 }
  0x89   : > { %3802 = vmatpush3.msra.mxu1 %v305_v15 }
  0x8a   : > { %3803 = vmatprep.subr.mxu1 %v303_v14 }
  0x8b   : > { %3804 = vmatpush3.msra.mxu1 %v303_v14  ;;  %v519_v17 = vpop.permute.xlu0 %518  ;;  %v517_v19 = vpop.permute.xlu1 %516 }
  0x8c   : > { %3805 = vmatprep.subr.mxu1 %v301_v16  ;;  %3827 = vmatprep.subr.mxu0 %v519_v17 }
  0x8d   : > { %3806 = vmatpush3.msra.mxu1 %v301_v16  ;;  %3828 = vmatpush3.msra.mxu0 %v519_v17 }
  0x8e   : > { %3808 = vmatmul.mubr.msk.f32.vlgmr.msra.gmra.mxu1 %vm312_vm0, %v3325_v18  ;;  %3813 = vmatprep.subr.mxu1 %v4301_v1 }
  0x8f   : > { %3814 = vmatpush3.msra.mxu1 %v4301_v1  ;;  %3829 = vmatprep.subr.mxu0 %v517_v19  ;;  %v515_v22 = vpop.permute.xlu0 %514  ;;  %v513_v23 = vpop.permute.xlu1 %512 }
  0x90   : > { %3815 = vmatprep.subr.mxu1 %v4309_v3  ;;  %3810 = vmatprep.mubr.msk.f32.mxu1 %vm312_vm0, %v3326_v20  ;;  %v702_v20 = vld [vmem:[%s5479_s3 + $0x8] sm:$0xff] }
  0x91   : > { %3816 = vmatpush3.msra.mxu1 %v4309_v3  ;;  %3830 = vmatpush3.msra.mxu0 %v517_v19 }
  0x92   : > { %3811 = vmatmul.mubr.msk.f32.gmra.mxu1 %vm312_vm0, %v3327_v21  ;;  %3817 = vmatprep.subr.mxu1 %v4303_v2  ;;  %v703_v21 = vld [vmem:[%s5479_s3 + $0x10] sm:$0xff] }
  0x93   : > { %3831 = vmatprep.subr.mxu0 %v515_v22  ;;  %3818 = vmatpush3.msra.mxu1 %v4303_v2 }
  0x94   : > { %3832 = vmatpush3.msra.mxu0 %v515_v22  ;;  %3819 = vmatprep.subr.mxu1 %v4311_v4  ;;  %v704_v22 = vld [vmem:[%s5479_s3 + $0x18] sm:$0xff] }
  0x95   : > { %3833 = vmatprep.subr.mxu0 %v513_v23  ;;  %3820 = vmatpush3.msra.mxu1 %v4311_v4 }
  0x96   : > { %3821 = vmatprep.mubr.msk.f32.mxu1 %vm312_vm0, %v287_v24  ;;  %3834 = vmatpush3.msra.mxu0 %v513_v23  ;;  %v705_v23 = vld [vmem:[%s5479_s3 + $0x20] sm:$0xff]  ;;  %v706_v24 = vld [vmem:[%s5479_s3 + $0x28] sm:$0xff] }
  0x97   : > { %3822 = vmatmul.mubr.msk.f32.vlgmr.msra.gmra.mxu1 %vm312_vm0, %v288_v25  ;;  %3836 = vmatmul.mubr.msk.f32.vlgmr.msra.gmra.mxu0 %vm312_vm0, %v3337_v26  ;;  %v707_v25 = vld [vmem:[%s5479_s3 + $0x30] sm:$0xff]  ;;  %v708_v26 = vld [vmem:[%s5479_s3 + $0x38] sm:$0xff] }
  0x98   : > { %3824 = vmatprep.mubr.msk.f32.mxu1 %vm312_vm0, %v289_v27  ;;  %3838 = vmatprep.mubr.msk.f32.mxu0 %vm312_vm0, %v3338_v28  ;;  %v3384_v27 = vld [vmem:[%s5479_s3 + $0xc0] sm:$0xff]  ;;  %v699_v28 = vld [vmem:[%s5480_s4 + $0x30] sm:$0xff] }
  0x9b   : > { %3825 = vmatmul.mubr.msk.f32.gmra.mxu1 %vm312_vm0, %v290_v29  ;;  %3839 = vmatmul.mubr.msk.f32.gmra.mxu0 %vm312_vm0, %v3339_v30  ;;  %v698_v29 = vld [vmem:[%s5480_s4 + $0x28] sm:$0xff]  ;;  %v700_v30 = vld [vmem:[%s5480_s4 + $0x38] sm:$0xff] }
  0x9c   : > { %v638_v31 = vpop.permute.xlu1 %637  ;;  %v643_v38 = vpop.permute.xlu0 %642  ;;  %3849 = vmatprep.mubr.msk.f32.mxu1 %vm312_vm0, %v3344_v63  ;;  %3869 = vmatprep.mubr.msk.f32.mxu0 %vm312_vm0, %v701_v0  ;;  %v3386_v63 = vld [vmem:[%s5479_s3 + $0xd0] sm:$0xff] }
  0xa0   : > { %v633_v32 = vpop.permute.xlu1 %632 }
  0xa1   : > { %v667_v44 = vpop.permute.xlu0 %666 }
  0xa4   : > { %v628_v33 = vpop.permute.xlu1 %627 }
  0xa6   : > { %v687_v58 = vpop.permute.xlu0 %686 }
  0xa9   : > { %v663_v36 = vpop.permute.xlu1 %662 }
  0xab   : > { %v655_v9 = vpop.permute.xlu0 %654 }
  0xad   : > { %v659_v40 = vpop.permute.xlu1 %658 }
  0xb2   : > { %v683_v53 = vpop.permute.xlu1 %682 }
  0xb6   : > { %v679_v4 = vpop.permute.xlu1 %678 }
  0xba   : > { %v675_v17 = vpop.permute.xlu1 %674 }
 0x14e   : > { %v3809_v34 = vpop.f32.mrf.mxu1 }
 0x150   : > { %v391_v35 = vpop.f32.mrf.mxu1 }
 0x152   : > { %v3812_v37 = vpop.f32.mrf.mxu1 }
 0x154   : > { %v401_v39 = vpop.f32.mrf.mxu1 }
 0x157   : > { %v3823_v41 = vpop.f32.mrf.mxu1  ;;  %v3837_v42 = vpop.f32.mrf.mxu0 }
 0x158   : > { %v494_v43 = vadd.f32 %v3823_v41, %v3809_v34  ;;  %v695_v34 = vld [vmem:[%s5480_s4 + $0x10] sm:$0xff] }
 0x159   : > { %v488_v45 = vpop.f32.mrf.mxu1  ;;  %v602_v46 = vpop.f32.mrf.mxu0  ;;  %v3346_v41 = vld [vmem:[%s5479_s3 + $0x50] sm:$0xff] }
 0x15a   : > { %v622_v47 = vadd.f32 %v3837_v42, %v494_v43  ;;  %v489_v48 = vadd.f32 %v488_v45, %v391_v35  ;;  %v694_v35 = vld [vmem:[%s5480_s4 + $0x8] sm:$0xff]  ;;  %v3347_v43 = vld [vmem:[%s5479_s3 + $0x58] sm:$0xff] }
 0x15b   : > { %v3826_v49 = vpop.f32.mrf.mxu1  ;;  %v3840_v50 = vpop.f32.mrf.mxu0 }
 0x15c   : > { %v621_v51 = vadd.f32 %v602_v46, %v489_v48  ;;  %v504_v52 = vadd.f32 %v3826_v49, %v3812_v37  ;;  %v646_v55 = vadd.f32 %v633_v32, %v622_v47  ;;  %v693_v32 = vld [vmem:[%s5480_s4] sm:$0xff]  ;;  %v3349_v47 = vld [vmem:[%s5479_s3 + $0x68] sm:$0xff]  ;;  %v3350_v48 = vld [vmem:[%s5479_s3 + $0x70] sm:$0xff] }
 0x15d   : > { %v498_v54 = vpop.f32.mrf.mxu1  ;;  %v612_v59 = vpop.f32.mrf.mxu0 }
 0x15e   : > { %v624_v56 = vadd.f32 %v3840_v50, %v504_v52  ;;  %v499_v57 = vadd.f32 %v498_v54, %v401_v39  ;;  %v645_v60 = vadd.f32 %v628_v33, %v621_v51  ;;  %v650_v1 = vmax.f32 %v646_v55, 0.0  ;;  %v696_v33 = vld [vmem:[%s5480_s4 + $0x18] sm:$0xff]  ;;  %v3368_v52 = vld [vmem:[%s5479_s3 + $0x80] sm:$0xff]  ;;  %v3369_v55 = vld [vmem:[%s5479_s3 + $0x88] sm:$0xff] }
 0x15f   : > { %v3351_v51 = vld [vmem:[%s5479_s3 + $0x78] sm:$0xff] }
 0x160   : > { %v648_v61 = vadd.f32 %v643_v38, %v624_v56  ;;  %v623_v62 = vadd.f32 %v612_v59, %v499_v57  ;;  %v649_v5 = vmax.f32 %v645_v60, 0.0  ;;  %v670_v11 = vmul.f32 %v659_v40, %v650_v1  ;;  %v3345_v40 = vld [vmem:[%s5479_s3 + $0x48] sm:$0xff]  ;;  %v3370_v57 = vld [vmem:[%s5479_s3 + $0x90] sm:$0xff]  ;;  %v3371_v59 = vld [vmem:[%s5479_s3 + $0x98] sm:$0xff] }
 0x161   : > { %v3385_v60 = vld [vmem:[%s5479_s3 + $0xc8] sm:$0xff] }
 0x162   : > { %v652_v2 = vmax.f32 %v648_v61, 0.0  ;;  %v647_v3 = vadd.f32 %v638_v31, %v623_v62  ;;  %v669_v16 = vmul.f32 %v655_v9, %v649_v5  ;;  %v690_v18 = vadd.f32 %v679_v4, %v670_v11  ;;  %v697_v31 = vld [vmem:[%s5480_s4 + $0x20] sm:$0xff]  ;;  %v3373_v1 = vld [vmem:[%s5479_s3 + $0xa8] sm:$0xff]  ;;  %v3375_v5 = vld [vmem:[%s5479_s3 + $0xb8] sm:$0xff] }
 0x163   : > { %v3372_v62 = vld [vmem:[%s5479_s3 + $0xa0] sm:$0xff]  ;;  %v3391_v11 = vld [vmem:[%s5479_s3 + $0xf8] sm:$0xff] }
 0x164   : > { %v672_v7 = vmul.f32 %v667_v44, %v652_v2  ;;  %v651_v8 = vmax.f32 %v647_v3, 0.0  ;;  %v689_v19 = vadd.f32 %v675_v17, %v669_v16  ;;  %v3348_v44 = vld [vmem:[%s5479_s3 + $0x60] sm:$0xff]  ;;  %v3387_v2 = vld [vmem:[%s5479_s3 + $0xd8] sm:$0xff]  ;;  %v3374_v3 = vld [vmem:[%s5479_s3 + $0xb0] sm:$0xff] }
 0x165   : > { %v3388_v4 = vld [vmem:[%s5479_s3 + $0xe0] sm:$0xff]  ;;  %v3405_v17 = vld [vmem:[%s5479_s3 + $0x128] sm:$0xff] }
 0x166   : > { %v692_v13 = vadd.f32 %v687_v58, %v672_v7  ;;  %v671_v14 = vmul.f32 %v663_v36, %v651_v8  ;;  %v3389_v7 = vld [vmem:[%s5479_s3 + $0xe8] sm:$0xff]  ;;  %v3390_v8 = vld [vmem:[%s5479_s3 + $0xf0] sm:$0xff]  ;;  %v3400_v9 = vld [vmem:[%s5479_s3 + $0x100] sm:$0xff] }
 0x167   : > { %v3404_v16 = vld [vmem:[%s5479_s3 + $0x120] sm:$0xff] }
 0x168   : > { %v691_v15 = vadd.f32 %v683_v53, %v671_v14  ;;  %728 = vrot.lane.b32.xlu0 %v692_v13, %s4234_s9  ;;  %3861 = vmatprep.subr.mxu0 %v692_v13  ;;  %v3402_v14 = vld [vmem:[%s5479_s3 + $0x110] sm:$0xff] }
 0x169   : > { %3862 = vmatpush3.msra.mxu0 %v692_v13 }
 0x16a   : > { %726 = vrot.lane.b32.xlu1 %v691_v15, %s4234_s9  ;;  %3863 = vmatprep.subr.mxu0 %v691_v15 }
 0x16b   : > { %3864 = vmatpush3.msra.mxu0 %v691_v15 }
 0x16c   : > { %724 = vrot.lane.b32.xlu0 %v690_v18, %s4234_s9  ;;  %3865 = vmatprep.subr.mxu0 %v690_v18 }
 0x16d   : > { %3866 = vmatpush3.msra.mxu0 %v690_v18 }
 0x16e   : > { %722 = vrot.lane.b32.xlu1 %v689_v19, %s4234_s9  ;;  %3867 = vmatprep.subr.mxu0 %v689_v19 }
 0x16f   : > { %3868 = vmatpush3.msra.mxu0 %v689_v19 }
 0x170   : > { %1007 = vrot.lane.b32.xlu0 %v692_v13, %s4235_s12  ;;  %3870 = vmatmul.mubr.msk.f32.vlgmr.msra.gmra.mxu0 %vm312_vm0, %v702_v20 }
 0x171   : > { %3872 = vmatprep.mubr.msk.f32.mxu0 %vm312_vm0, %v703_v21 }
 0x172   : > { %1005 = vrot.lane.b32.xlu1 %v691_v15, %s4235_s12 }
 0x174   : > { %1003 = vrot.lane.b32.xlu0 %v690_v18, %s4235_s12  ;;  %3873 = vmatmul.mubr.msk.f32.gmra.mxu0 %vm312_vm0, %v704_v22 }
 0x175   : > { %3875 = vmatprep.mubr.msk.f32.mxu0 %vm312_vm0, %v705_v23 }
 0x176   : > { %1001 = vrot.lane.b32.xlu1 %v689_v19, %s4235_s12 }
 0x178   : > { %1165 = vrot.lane.b32.xlu0 %v692_v13, %s4239_s19  ;;  %3876 = vmatmul.mubr.msk.f32.gmra.mxu0 %vm312_vm0, %v706_v24 }
 0x179   : > { %3878 = vmatprep.mubr.msk.f32.mxu0 %vm312_vm0, %v707_v25 }
 0x17a   : > { %1161 = vrot.lane.b32.xlu1 %v690_v18, %s4239_s19 }
 0x17c   : > { %1323 = vrot.lane.b32.xlu0 %v692_v13, %s4240_s26  ;;  %3879 = vmatmul.mubr.msk.f32.gmra.mxu0 %vm312_vm0, %v708_v26  ;;  %v3401_v13 = vld [vmem:[%s5479_s3 + $0x108] sm:$0xff] }
 0x17d   : > { %3909 = vmatprep.mubr.msk.f32.mxu0 %vm312_vm0, %v3384_v27 }
 0x17e   : > { %1163 = vrot.lane.b32.xlu1 %v691_v15, %s4239_s19 }
 0x180   : > { %1321 = vrot.lane.b32.xlu0 %v691_v15, %s4240_s26  ;;  %v3403_v15 = vld [vmem:[%s5479_s3 + $0x118] sm:$0xff] }
 0x182   : > { %1159 = vrot.lane.b32.xlu1 %v689_v19, %s4239_s19 }
 0x184   : > { %1319 = vrot.lane.b32.xlu0 %v690_v18, %s4240_s26  ;;  %v3406_v18 = vld [vmem:[%s5479_s3 + $0x130] sm:$0xff] }
 0x186   : > { %1317 = vrot.lane.b32.xlu1 %v689_v19, %s4240_s26  ;;  %v3407_v19 = vld [vmem:[%s5479_s3 + $0x138] sm:$0xff] }
 0x188   : > { %1591 = vperm.xlu0 %4206, %v700_v30  }
 0x18a   : > { %1498 = vperm.xlu1 %4204, %v699_v28  }
 0x18c   : > { %1587 = vperm.xlu0 %4206, %v699_v28  }
 0x18e   : > { %1493 = vperm.xlu1 %4204, %v698_v29  }
 0x190   : > { %4209 = vset.pattern.permute.xlu0 %v4236_v6 }
 0x191   : > { %1503 = vperm.xlu0 %4209, %v700_v30  }
 0x192   : > { %1488 = vperm.xlu1 %4204, %v697_v31  }
 0x195   : > { %1468 = vperm.xlu0 %4209, %v693_v32  }
 0x196   : > { %4205 = vset.pattern.permute.xlu1 %v5486_v10 }
 0x197   : > { %1547 = vperm.xlu1 %4205, %v699_v28  }
 0x199   : > { %4214 = vset.pattern.permute.xlu0 %v5486_v10 }
 0x19a   : > { %1551 = vperm.xlu0 %4214, %v700_v30  }
 0x19b   : > { %4207 = vset.pattern.permute.xlu1 %v4236_v6 }
 0x19c   : > { %1483 = vperm.xlu1 %4207, %v696_v33  }
 0x19e   : > { %1539 = vperm.xlu0 %4214, %v697_v31  }
 0x1a0   : > { %4208 = vset.pattern.permute.xlu1 %v5486_v10 }
 0x1a1   : > { %1543 = vperm.xlu1 %4208, %v698_v29  }
 0x1a2   : > { %1535 = vperm.xlu0 %4214, %v696_v33  }
 0x1a5   : > { %4210 = vset.pattern.permute.xlu1 %v4236_v6 }
 0x1a6   : > { %1478 = vperm.xlu1 %4210, %v695_v34   ;;  %1527 = vperm.xlu0 %4214, %v694_v35  }
 0x1aa   : > { %4211 = vset.pattern.permute.xlu1 %v5484_v12  ;;  %4218 = vset.pattern.permute.xlu0 %v5484_v12 }
 0x1ab   : > { %1583 = vperm.xlu1 %4211, %v698_v29   ;;  %1567 = vperm.xlu0 %4218, %v694_v35  }
 0x1af   : > { %4212 = vset.pattern.permute.xlu1 %v4236_v6  ;;  %4221 = vset.pattern.permute.xlu0 %v4236_v6 }
 0x1b0   : > { %1473 = vperm.xlu1 %4212, %v694_v35  }
 0x1b4   : > { %4213 = vset.pattern.permute.xlu1 %v5484_v12 }
 0x1b5   : > { %1579 = vperm.xlu1 %4213, %v697_v31  }
 0x1b9   : > { %4215 = vset.pattern.permute.xlu1 %v5486_v10 }
 0x1ba   : > { %1531 = vperm.xlu1 %4215, %v695_v34  }
 0x1be   : > { %4216 = vset.pattern.permute.xlu1 %v5484_v12 }
 0x1bf   : > { %1575 = vperm.xlu1 %4216, %v696_v33  }
 0x1c3   : > { %1571 = vperm.xlu1 %4216, %v695_v34  }
 0x1c7   : > { %4217 = vset.pattern.permute.xlu1 %v5486_v10 }
 0x1c8   : > { %1523 = vperm.xlu1 %4217, %v693_v32  }
 0x1cc   : > { %4219 = vset.pattern.permute.xlu1 %v5484_v12 }
 0x1cd   : > { %1563 = vperm.xlu1 %4219, %v693_v32  }
 0x1d1   : > { %4220 = vset.pattern.permute.xlu1 %v4236_v6 }
 0x1da   : > { %v729_v36 = vpop.permute.xlu0 %728 }
 0x1db   : > { %3841 = vmatprep.subr.mxu1 %v729_v36 }
 0x1dc   : > { %3842 = vmatpush3.msra.mxu1 %v729_v36  ;;  %v727_v37 = vpop.permute.xlu1 %726 }
 0x1dd   : > { %3843 = vmatprep.subr.mxu1 %v727_v37 }
 0x1de   : > { %v725_v38 = vpop.permute.xlu0 %724  ;;  %3844 = vmatpush3.msra.mxu1 %v727_v37 }
 0x1df   : > { %3845 = vmatprep.subr.mxu1 %v725_v38 }
 0x1e0   : > { %3846 = vmatpush3.msra.mxu1 %v725_v38  ;;  %v723_v39 = vpop.permute.xlu1 %722 }
 0x1e1   : > { %3847 = vmatprep.subr.mxu1 %v723_v39 }
 0x1e2   : > { %v1008_v6 = vpop.permute.xlu0 %1007  ;;  %3848 = vmatpush3.msra.mxu1 %v723_v39 }
 0x1e3   : > { %3850 = vmatmul.mubr.msk.f32.vlgmr.msra.gmra.mxu1 %vm312_vm0, %v3345_v40  ;;  %3881 = vmatprep.subr.mxu1 %v1008_v6 }
 0x1e4   : > { %3882 = vmatpush3.msra.mxu1 %v1008_v6  ;;  %v1006_v42 = vpop.permute.xlu1 %1005  ;;  %3852 = vmatprep.mubr.msk.f32.mxu1 %vm312_vm0, %v3346_v41 }
 0x1e5   : > { %3883 = vmatprep.subr.mxu1 %v1006_v42 }
 0x1e6   : > { %v1004_v45 = vpop.permute.xlu0 %1003  ;;  %3884 = vmatpush3.msra.mxu1 %v1006_v42 }
 0x1e7   : > { %3853 = vmatmul.mubr.msk.f32.gmra.mxu1 %vm312_vm0, %v3347_v43  ;;  %3885 = vmatprep.subr.mxu1 %v1004_v45 }
 0x1e8   : > { %3886 = vmatpush3.msra.mxu1 %v1004_v45  ;;  %v1002_v46 = vpop.permute.xlu1 %1001  ;;  %3855 = vmatprep.mubr.msk.f32.mxu1 %vm312_vm0, %v3348_v44 }
 0x1e9   : > { %3887 = vmatprep.subr.mxu1 %v1002_v46 }
 0x1ea   : > { %v1166_v49 = vpop.permute.xlu0 %1165  ;;  %3888 = vmatpush3.msra.mxu1 %v1002_v46 }
 0x1eb   : > { %3856 = vmatmul.mubr.msk.f32.gmra.mxu1 %vm312_vm0, %v3349_v47  ;;  %3901 = vmatprep.subr.mxu0 %v1166_v49 }
 0x1ec   : > { %3902 = vmatpush3.msra.mxu0 %v1166_v49  ;;  %v1162_v50 = vpop.permute.xlu1 %1161  ;;  %3858 = vmatprep.mubr.msk.f32.mxu1 %vm312_vm0, %v3350_v48 }
 0x1ee   : > { %v1324_v53 = vpop.permute.xlu0 %1323 }
 0x1ef   : > { %3859 = vmatmul.mubr.msk.f32.gmra.mxu1 %vm312_vm0, %v3351_v51  ;;  %3921 = vmatprep.subr.mxu1 %v1324_v53 }
 0x1f0   : > { %v1164_v54 = vpop.permute.xlu1 %1163  ;;  %3889 = vmatprep.mubr.msk.f32.mxu1 %vm312_vm0, %v3368_v52 }
 0x1f1   : > { %3903 = vmatprep.subr.mxu0 %v1164_v54 }
 0x1f2   : > { %v1322_v56 = vpop.permute.xlu0 %1321  ;;  %3904 = vmatpush3.msra.mxu0 %v1164_v54 }
 0x1f3   : > { %3890 = vmatmul.mubr.msk.f32.vlgmr.msra.gmra.mxu1 %vm312_vm0, %v3369_v55  ;;  %3905 = vmatprep.subr.mxu0 %v1162_v50 }
 0x1f4   : > { %3922 = vmatpush3.msra.mxu1 %v1324_v53  ;;  %3906 = vmatpush3.msra.mxu0 %v1162_v50  ;;  %v1160_v58 = vpop.permute.xlu1 %1159 }
 0x1f5   : > { %3923 = vmatprep.subr.mxu1 %v1322_v56  ;;  %3907 = vmatprep.subr.mxu0 %v1160_v58 }
 0x1f6   : > { %3924 = vmatpush3.msra.mxu1 %v1322_v56  ;;  %v1320_v61 = vpop.permute.xlu0 %1319  ;;  %3892 = vmatprep.mubr.msk.f32.mxu1 %vm312_vm0, %v3370_v57 }
 0x1f7   : > { %3908 = vmatpush3.msra.mxu0 %v1160_v58  ;;  %3893 = vmatmul.mubr.msk.f32.gmra.mxu1 %vm312_vm0, %v3371_v59 }
 0x1f8   : > { %3910 = vmatmul.mubr.msk.f32.vlgmr.msra.gmra.mxu0 %vm312_vm0, %v3385_v60  ;;  %3925 = vmatprep.subr.mxu1 %v1320_v61  ;;  %v1318_v0 = vpop.permute.xlu1 %1317 }
 0x1f9   : > { %3926 = vmatpush3.msra.mxu1 %v1320_v61  ;;  %3895 = vmatprep.mubr.msk.f32.mxu1 %vm312_vm0, %v3372_v62 }
 0x1fa   : > { %3927 = vmatprep.subr.mxu1 %v1318_v0  ;;  %3912 = vmatprep.mubr.msk.f32.mxu0 %vm312_vm0, %v3386_v63 }
 0x1fb   : > { %3928 = vmatpush3.msra.mxu1 %v1318_v0 }
 0x1fc   : > { %3896 = vmatmul.mubr.msk.f32.gmra.mxu1 %vm312_vm0, %v3373_v1  ;;  %3913 = vmatmul.mubr.msk.f32.gmra.mxu0 %vm312_vm0, %v3387_v2 }
 0x1fd   : > { %3898 = vmatprep.mubr.msk.f32.mxu1 %vm312_vm0, %v3374_v3  ;;  %3915 = vmatprep.mubr.msk.f32.mxu0 %vm312_vm0, %v3388_v4 }
 0x200   : > { %3899 = vmatmul.mubr.msk.f32.gmra.mxu1 %vm312_vm0, %v3375_v5  ;;  %3916 = vmatmul.mubr.msk.f32.gmra.mxu0 %vm312_vm0, %v3389_v7 }
 0x201   : > { %3918 = vmatprep.mubr.msk.f32.mxu0 %vm312_vm0, %v3390_v8  ;;  %3929 = vmatprep.mubr.msk.f32.mxu1 %vm312_vm0, %v3400_v9 }
 0x203   : > { %v4626_v34 = vpop.permute.xlu0 %1591 }
 0x204   : > { %3919 = vmatmul.mubr.msk.f32.gmra.mxu0 %vm312_vm0, %v3391_v11  ;;  %3930 = vmatmul.mubr.msk.f32.vlgmr.msra.gmra.mxu1 %vm312_vm0, %v3401_v13 }
 0x205   : > { %3932 = vmatprep.mubr.msk.f32.mxu1 %vm312_vm0, %v3402_v14  ;;  %v4614_v20 = vpop.permute.xlu1 %1498 }
 0x207   : > { %v4630_v40 = vpop.permute.xlu0 %1587 }
 0x208   : > { %3933 = vmatmul.mubr.msk.f32.gmra.mxu1 %vm312_vm0, %v3403_v15  ;;  %5488 = vst [vmem:[#allocation2_spill] sm:$0xff] %v4630_v40 }
 0x209   : > { %3935 = vmatprep.mubr.msk.f32.mxu1 %vm312_vm0, %v3404_v16  ;;  %v4616_v21 = vpop.permute.xlu1 %1493 }
 0x20c   : > { %3936 = vmatmul.mubr.msk.f32.gmra.mxu1 %vm312_vm0, %v3405_v17  ;;  %v4634_v45 = vpop.permute.xlu0 %1503 }
 0x20d   : > { %3938 = vmatprep.mubr.msk.f32.mxu1 %vm312_vm0, %v3406_v18  ;;  %v4618_v22 = vpop.permute.xlu1 %1488 }
 0x210   : > { %3939 = vmatmul.mubr.msk.f32.gmra.mxu1 %vm312_vm0, %v3407_v19  ;;  %v4638_v53 = vpop.permute.xlu0 %1468 }
 0x212   : > { %v4620_v23 = vpop.permute.xlu1 %1547 }
 0x215   : > { %v4642_v61 = vpop.permute.xlu0 %1551 }
 0x217   : > { %v4622_v26 = vpop.permute.xlu1 %1483 }
 0x219   : > { %v1540_v14 = vpop.permute.xlu0 %1539 }
 0x21c   : > { %v4624_v30 = vpop.permute.xlu1 %1543 }
 0x221   : > { %v4628_v37 = vpop.permute.xlu1 %1478 }
 0x226   : > { %v4632_v42 = vpop.permute.xlu1 %1583 }
 0x22b   : > { %v4636_v48 = vpop.permute.xlu1 %1473 }
 0x230   : > { %v3871_v24 = vpop.f32.mrf.mxu0  ;;  %v4640_v56 = vpop.permute.xlu1 %1579 }
 0x232   : > { %v953_v25 = vpop.f32.mrf.mxu0 }
 0x234   : > { %v3874_v27 = vpop.f32.mrf.mxu0 }
 0x235   : > { %v1532_v0 = vpop.permute.xlu1 %1531 }
 0x236   : > { %v963_v31 = vpop.f32.mrf.mxu0 }
 0x238   : > { %v3877_v35 = vpop.f32.mrf.mxu0 }
 0x23a   : > { %v973_v39 = vpop.f32.mrf.mxu0 }
 0x23c   : > { %v3880_v43 = vpop.f32.mrf.mxu0 }
 0x23e   : > { %v983_v47 = vpop.f32.mrf.mxu0 }
 0x2a3   : > { %v3851_v28 = vpop.f32.mrf.mxu1 }
 0x2a4   : > { %v959_v9 = vadd.f32 %v3871_v24, %v3851_v28 }
 0x2a5   : > { %v824_v29 = vpop.f32.mrf.mxu1 }
 0x2a6   : > { %v954_v11 = vadd.f32 %v953_v25, %v824_v29 }
 0x2a7   : > { %v3854_v32 = vpop.f32.mrf.mxu1 }
 0x2a8   : > { %v969_v63 = vadd.f32 %v3874_v27, %v3854_v32  ;;  %v1576_v32 = vpop.permute.xlu1 %1575 }
 0x2a9   : > { %v834_v33 = vpop.f32.mrf.mxu1 }
 0x2aa   : > { %v964_v2 = vadd.f32 %v963_v31, %v834_v33 }
 0x2ab   : > { %v3857_v36 = vpop.f32.mrf.mxu1 }
 0x2ac   : > { %v979_v13 = vadd.f32 %v3877_v35, %v3857_v36 }
 0x2ad   : > { %v844_v38 = vpop.f32.mrf.mxu1 }
 0x2ae   : > { %v974_v16 = vadd.f32 %v973_v39, %v844_v38 }
 0x2af   : > { %v3860_v41 = vpop.f32.mrf.mxu1 }
 0x2b0   : > { %v989_v31 = vadd.f32 %v3880_v43, %v3860_v41 }
 0x2b1   : > { %v854_v6 = vpop.f32.mrf.mxu1 }
 0x2b3   : > { %v3891_v44 = vpop.f32.mrf.mxu1 }
 0x2b4   : > { %v1143_v12 = vadd.f32 %v3891_v44, %v959_v9 }
 0x2b5   : > { %v1103_v46 = vpop.f32.mrf.mxu1 }
 0x2b6   : > { %v1142_v10 = vadd.f32 %v1103_v46, %v954_v11 }
 0x2b7   : > { %v3894_v49 = vpop.f32.mrf.mxu1 }
 0x2b8   : > { %v3911_v50 = vpop.f32.mrf.mxu0  ;;  %v1145_v3 = vadd.f32 %v3894_v49, %v969_v63 }
 0x2b9   : > { %v1113_v51 = vpop.f32.mrf.mxu1  ;;  %v1301_v24 = vadd.f32 %v3911_v50, %v1143_v12 }
 0x2ba   : > { %v1261_v52 = vpop.f32.mrf.mxu0  ;;  %v1144_v7 = vadd.f32 %v1113_v51, %v964_v2 }
 0x2bb   : > { %v1300_v25 = vadd.f32 %v1261_v52, %v1142_v10  ;;  %v1572_v10 = vpop.permute.xlu1 %1571 }
 0x2bc   : > { %v3897_v54 = vpop.f32.mrf.mxu1  ;;  %v3914_v55 = vpop.f32.mrf.mxu0 }
 0x2bd   : > { %v1303_v8 = vadd.f32 %v3914_v55, %v1145_v3  ;;  %v1147_v27 = vadd.f32 %v3897_v54, %v979_v13  ;;  %v984_v55 = vadd.f32 %v983_v47, %v854_v6  ;;  %v1536_v54 = vpop.permute.xlu0 %1535 }
 0x2be   : > { %v1123_v57 = vpop.f32.mrf.mxu1  ;;  %v1271_v58 = vpop.f32.mrf.mxu0 }
 0x2bf   : > { %v1302_v17 = vadd.f32 %v1271_v58, %v1144_v7  ;;  %v1146_v33 = vadd.f32 %v1123_v57, %v974_v16 }
 0x2c0   : > { %v3900_v59 = vpop.f32.mrf.mxu1  ;;  %v3917_v60 = vpop.f32.mrf.mxu0 }
 0x2c1   : > { %v1305_v28 = vadd.f32 %v3917_v60, %v1147_v27  ;;  %v1149_v35 = vadd.f32 %v3900_v59, %v989_v31  ;;  %v1528_v13 = vpop.permute.xlu0 %1527  ;;  %v1615_v31 = vld [vmem:[%s5481_s5 + $0x8] sm:$0xff] }
 0x2c2   : > { %v1133_v62 = vpop.f32.mrf.mxu1  ;;  %v1281_v4 = vpop.f32.mrf.mxu0 }
 0x2c3   : > { %v1304_v36 = vadd.f32 %v1281_v4, %v1146_v33  ;;  %v1148_v46 = vadd.f32 %v1133_v62, %v984_v55  ;;  %v1616_v33 = vld [vmem:[%s5481_s5 + $0x10] sm:$0xff]  ;;  %v1619_v55 = vld [vmem:[%s5481_s5 + $0x28] sm:$0xff] }
 0x2c4   : > { %v3931_v1 = vpop.f32.mrf.mxu1  ;;  %v3920_v18 = vpop.f32.mrf.mxu0 }
 0x2c5   : > { %v1459_v58 = vadd.f32 %v3931_v1, %v1301_v24  ;;  %v1307_v57 = vadd.f32 %v3920_v18, %v1149_v35  ;;  %v1568_v18 = vpop.permute.xlu0 %1567  ;;  %v1620_v24 = vld [vmem:[%s5481_s5 + $0x30] sm:$0xff] }
 0x2c6   : > { %v1419_v5 = vpop.f32.mrf.mxu1  ;;  %v1291_v38 = vpop.f32.mrf.mxu0  ;;  %v1624_v35 = vld [vmem:[%s5481_s5 + $0x50] sm:$0xff] }
 0x2c7   : > { %v1458_v63 = vadd.f32 %v1419_v5, %v1300_v25  ;;  %v1306_v12 = vadd.f32 %v1291_v38, %v1148_v46  ;;  %v1507_v62 = vadd.f32 %v4636_v48, %v1459_v58  ;;  %v1621_v25 = vld [vmem:[%s5481_s5 + $0x38] sm:$0xff]  ;;  %v3476_v38 = vld [vmem:[%s5481_s5 + $0x120] sm:$0xff]  ;;  %v4853_v58 = vld [vmem:[%s5482_s6 + $0x8] sm:$0xff] }
 0x2c8   : > { %v3934_v15 = vpop.f32.mrf.mxu1  ;;  %v4842_v46 = vld [vmem:[%s5482_s6 + $0x18] sm:$0xff] }
 0x2c9   : > { %v1461_v19 = vadd.f32 %v3934_v15, %v1303_v8  ;;  %v1506_v1 = vadd.f32 %v4638_v53, %v1458_v63  ;;  %v1515_v48 = vmax.f32 %v1507_v62, 0.0  ;;  %v1524_v53 = vpop.permute.xlu1 %1523  ;;  %v4860_v63 = vld [vmem:[%s5482_s6 + $0x38] sm:$0xff] }
 0x2ca   : > { %v1429_v40 = vpop.f32.mrf.mxu1 }
 0x2cb   : > { %v1509_v49 = vadd.f32 %v4622_v26, %v1461_v19  ;;  %v1460_v51 = vadd.f32 %v1429_v40, %v1302_v17  ;;  %v5489_v19 = vld [vmem:[#allocation2_spill] sm:$0xff] }
 0x2cc   : > { %v3937_v29 = vpop.f32.mrf.mxu1 }
 0x2cd   : > { %v1517_v39 = vmax.f32 %v1509_v49, 0.0  ;;  %v1508_v44 = vadd.f32 %v4628_v37, %v1460_v51  ;;  %v1463_v41 = vadd.f32 %v3937_v29, %v1305_v28  ;;  %v1617_v49 = vld [vmem:[%s5481_s5 + $0x18] sm:$0xff]  ;;  %v1618_v51 = vld [vmem:[%s5481_s5 + $0x20] sm:$0xff]  ;;  %v1623_v29 = vld [vmem:[%s5481_s5 + $0x48] sm:$0xff] }
 0x2ce   : > { %v1439_v43 = vpop.f32.mrf.mxu1  ;;  %v1622_v28 = vld [vmem:[%s5481_s5 + $0x40] sm:$0xff] }
 0x2cf   : > { %v1557_v26 = vmul.f32 %v1536_v54, %v1517_v39  ;;  %v1516_v40 = vmax.f32 %v1508_v44, 0.0  ;;  %v1462_v6 = vadd.f32 %v1439_v43, %v1304_v36  ;;  %v1511_v47 = vadd.f32 %v4616_v21, %v1463_v41  ;;  %v1625_v36 = vld [vmem:[%s5481_s5 + $0x58] sm:$0xff]  ;;  %v4830_v39 = vld [vmem:[%s5482_s6] sm:$0xff]  ;;  %v4836_v44 = vld [vmem:[%s5482_s6 + $0x10] sm:$0xff] }
 0x2d0   : > { %v3940_v50 = vpop.f32.mrf.mxu1  ;;  %v4848_v54 = vld [vmem:[%s5482_s6 + $0x28] sm:$0xff]  ;;  %v4865_v41 = vld [vmem:[%s5482_s6 + $0x20] sm:$0xff]  ;;  %v4872_v43 = vld [vmem:[%s5482_s6 + $0x30] sm:$0xff] }
 0x2d1   : > { %v4647_v52 = vadd.f32 %v1576_v32, %v1557_v26  ;;  %v1556_v59 = vmul.f32 %v1532_v0, %v1516_v40  ;;  %v1510_v37 = vadd.f32 %v4618_v22, %v1462_v6  ;;  %v1465_v60 = vadd.f32 %v3940_v50, %v1307_v57  ;;  %v4877_v26 = vld [vmem:[%s5482_s6 + $0x48] sm:$0xff]  ;;  %v4884_v6 = vld [vmem:[%s5482_s6 + $0x40] sm:$0xff]  ;;  %v4896_v50 = vld [vmem:[%s5482_s6 + $0x50] sm:$0xff] }
 0x2d2   : > { %v1519_v2 = vmax.f32 %v1511_v47, 0.0  ;;  %v1449_v3 = vpop.f32.mrf.mxu1 }
 0x2d3   : > { %v4652_v4 = vadd.f32 %v1572_v10, %v1556_v59  ;;  %v1518_v5 = vmax.f32 %v1510_v37, 0.0  ;;  %v1513_v7 = vadd.f32 %v4634_v45, %v1465_v60  ;;  %v1464_v8 = vadd.f32 %v1449_v3, %v1306_v12  ;;  %1653 = vrot.lane.b32.xlu1 %v4647_v52, %s4234_s9  ;;  %v4889_v12 = vld [vmem:[%s5482_s6 + $0x58] sm:$0xff] }
 0x2d4   : > { %v1559_v21 = vmul.f32 %v4624_v30, %v1519_v2  ;;  %v1514_v45 = vmax.f32 %v1506_v1, 0.0  ;;  %v5490_v37 = vmov 1  }
 0x2d5   : > { %v1558_v0 = vmul.f32 %v1540_v14, %v1518_v5  ;;  %v1521_v22 = vmax.f32 %v1513_v7, 0.0  ;;  %v1512_v9 = vadd.f32 %v4614_v20, %v1464_v8  ;;  %1651 = vrot.lane.b32.xlu0 %v4652_v4, %s4234_s9  ;;  %v3417_v5 = vld [vmem:[%s5481_s5 + $0x68] sm:$0xff]  ;;  %v3418_v7 = vld [vmem:[%s5481_s5 + $0x70] sm:$0xff] }
 0x2d6   : > { %v4662_v11 = vadd.f32 %v4632_v42, %v1559_v21  ;;  %v1555_v42 = vmul.f32 %v1528_v13, %v1515_v48  ;;  %v1554_v17 = vmul.f32 %v1524_v53, %v1514_v45  ;;  %v3421_v53 = vld [vmem:[%s5481_s5 + $0x88] sm:$0xff]  ;;  %v3422_v13 = vld [vmem:[%s5481_s5 + $0x90] sm:$0xff] }
 0x2d7   : > { %v4665_v15 = vadd.f32 %v4640_v56, %v1558_v0  ;;  %v1561_v16 = vmul.f32 %v4642_v61, %v1521_v22  ;;  %v1520_v30 = vmax.f32 %v1512_v9, 0.0  ;;  %v1564_v61 = vpop.permute.xlu1 %1563  ;;  %v3419_v0 = vld [vmem:[%s5481_s5 + $0x78] sm:$0xff]  ;;  %v3420_v22 = vld [vmem:[%s5481_s5 + $0x80] sm:$0xff] }
 0x2d8   : > { %1657 = vrot.lane.b32.xlu1 %v4662_v11, %s4234_s9  ;;  %v4692_v27 = vadd.f32 %v1568_v18, %v1555_v42  ;;  %v4696_v32 = vadd.f32 %v1564_v61, %v1554_v17  ;;  %v3425_v42 = vld [vmem:[%s5481_s5 + $0xa8] sm:$0xff]  ;;  %v3426_v17 = vld [vmem:[%s5481_s5 + $0xb0] sm:$0xff]  ;;  %v3452_v61 = vld [vmem:[%s5481_s5 + $0xc0] sm:$0xff] }
 0x2d9   : > { %v4671_v20 = vadd.f32 %v4626_v34, %v1561_v16  ;;  %v1560_v14 = vmul.f32 %v4620_v23, %v1520_v30  ;;  %1655 = vrot.lane.b32.xlu0 %v4665_v15, %s4234_s9  ;;  %v3416_v23 = vld [vmem:[%s5481_s5 + $0x60] sm:$0xff] }
 0x2da   : > { %v1614_v34 = vld [vmem:[%s5481_s5] sm:$0xff]  ;;  %3957 = vmatprep.mubr.msk.f32.mxu0 %vm1671_vm1, %v3416_v23 }
 0x2db   : > { %v4677_v56 = vadd.f32 %v5489_v19, %v1560_v14  ;;  %3975 = vmatprep.subr.mxu1 %v4671_v20  ;;  %3991 = vmatprep.mubr.msk.f32.mxu1 %vm1671_vm1, %v1614_v34  ;;  %v3424_v16 = vld [vmem:[%s5481_s5 + $0xa0] sm:$0xff] }
 0x2dc   : > { %1661 = vrot.lane.b32.xlu1 %v4671_v20, %s4234_s9  ;;  %3976 = vmatpush3.msra.mxu1 %v4671_v20 }
 0x2dd   : > { %3977 = vmatprep.subr.mxu1 %v4677_v56  ;;  %1659 = vrot.lane.b32.xlu0 %v4677_v56, %s4234_s9 }
 0x2de   : > { %3978 = vmatpush3.msra.mxu1 %v4677_v56 }
 0x2df   : > { %3979 = vmatprep.subr.mxu1 %v4662_v11 }
 0x2e0   : > { %1649 = vrot.lane.b32.xlu1 %v4692_v27, %s4234_s9  ;;  %3980 = vmatpush3.msra.mxu1 %v4662_v11 }
 0x2e1   : > { %3981 = vmatprep.subr.mxu1 %v4665_v15  ;;  %1647 = vrot.lane.b32.xlu0 %v4696_v32, %s4234_s9 }
 0x2e2   : > { %3982 = vmatpush3.msra.mxu1 %v4665_v15 }
 0x2e3   : > { %3983 = vmatprep.subr.mxu1 %v4647_v52 }
 0x2e4   : > { %2021 = vrot.lane.b32.xlu1 %v4671_v20, %s4235_s12  ;;  %3984 = vmatpush3.msra.mxu1 %v4647_v52 }
 0x2e5   : > { %3985 = vmatprep.subr.mxu1 %v4652_v4  ;;  %2015 = vrot.lane.b32.xlu0 %v4665_v15, %s4235_s12 }
 0x2e6   : > { %3986 = vmatpush3.msra.mxu1 %v4652_v4 }
 0x2e7   : > { %3987 = vmatprep.subr.mxu1 %v4692_v27 }
 0x2e8   : > { %2017 = vrot.lane.b32.xlu1 %v4662_v11, %s4235_s12  ;;  %3988 = vmatpush3.msra.mxu1 %v4692_v27 }
 0x2e9   : > { %2011 = vrot.lane.b32.xlu0 %v4652_v4, %s4235_s12  ;;  %3989 = vmatprep.subr.mxu1 %v4696_v32 }
 0x2ea   : > { %3990 = vmatpush3.msra.mxu1 %v4696_v32 }
 0x2eb   : > { %3992 = vmatmul.mubr.msk.f32.vlgmr.msra.gmra.mxu1 %vm1671_vm1, %v1615_v31 }
 0x2ec   : > { %2013 = vrot.lane.b32.xlu1 %v4647_v52, %s4235_s12  ;;  %3994 = vmatprep.mubr.msk.f32.mxu1 %vm1671_vm1, %v1616_v33 }
 0x2ed   : > { %2007 = vrot.lane.b32.xlu0 %v4696_v32, %s4235_s12 }
 0x2ef   : > { %3995 = vmatmul.mubr.msk.f32.gmra.mxu1 %vm1671_vm1, %v1617_v49  ;;  %v3455_v49 = vld [vmem:[%s5481_s5 + $0xd8] sm:$0xff] }
 0x2f0   : > { %2009 = vrot.lane.b32.xlu1 %v4692_v27, %s4235_s12  ;;  %3997 = vmatprep.mubr.msk.f32.mxu1 %vm1671_vm1, %v1618_v51  ;;  %v3456_v51 = vld [vmem:[%s5481_s5 + $0xe0] sm:$0xff] }
 0x2f1   : > { %2227 = vrot.lane.b32.xlu0 %v4662_v11, %s4239_s19 }
 0x2f3   : > { %3998 = vmatmul.mubr.msk.f32.gmra.mxu1 %vm1671_vm1, %v1619_v55 }
 0x2f4   : > { %2231 = vrot.lane.b32.xlu1 %v4671_v20, %s4239_s19  ;;  %4000 = vmatprep.mubr.msk.f32.mxu1 %vm1671_vm1, %v1620_v24 }
 0x2f5   : > { %2019 = vrot.lane.b32.xlu0 %v4677_v56, %s4235_s12 }
 0x2f7   : > { %4001 = vmatmul.mubr.msk.f32.gmra.mxu1 %vm1671_vm1, %v1621_v25  ;;  %v3457_v25 = vld [vmem:[%s5481_s5 + $0xe8] sm:$0xff] }
 0x2f8   : > { %2441 = vrot.lane.b32.xlu1 %v4671_v20, %s4240_s26  ;;  %4003 = vmatprep.mubr.msk.f32.mxu1 %vm1671_vm1, %v1622_v28 }
 0x2f9   : > { %2225 = vrot.lane.b32.xlu0 %v4665_v15, %s4239_s19 }
 0x2fb   : > { %4004 = vmatmul.mubr.msk.f32.gmra.mxu1 %vm1671_vm1, %v1623_v29 }
 0x2fc   : > { %2437 = vrot.lane.b32.xlu1 %v4662_v11, %s4240_s26  ;;  %4006 = vmatprep.mubr.msk.f32.mxu1 %vm1671_vm1, %v1624_v35  ;;  %v3458_v35 = vld [vmem:[%s5481_s5 + $0xf0] sm:$0xff] }
 0x2fd   : > { %2223 = vrot.lane.b32.xlu0 %v4647_v52, %s4239_s19 }
 0x2ff   : > { %4007 = vmatmul.mubr.msk.f32.gmra.mxu1 %vm1671_vm1, %v1625_v36  ;;  %v3459_v36 = vld [vmem:[%s5481_s5 + $0xf8] sm:$0xff] }
 0x300   : > { %2435 = vrot.lane.b32.xlu1 %v4665_v15, %s4240_s26  ;;  %4059 = vmatprep.mubr.msk.f32.mxu1 %vm1671_vm1, %v3476_v38 }
 0x301   : > { %2221 = vrot.lane.b32.xlu0 %v4652_v4, %s4239_s19 }
 0x304   : > { %2433 = vrot.lane.b32.xlu1 %v4647_v52, %s4240_s26 }
 0x305   : > { %2219 = vrot.lane.b32.xlu0 %v4692_v27, %s4239_s19 }
 0x308   : > { %2431 = vrot.lane.b32.xlu1 %v4652_v4, %s4240_s26 }
 0x309   : > { %2229 = vrot.lane.b32.xlu0 %v4677_v56, %s4239_s19 }
 0x30c   : > { %2439 = vrot.lane.b32.xlu1 %v4677_v56, %s4240_s26 }
 0x30d   : > { %2217 = vrot.lane.b32.xlu0 %v4696_v32, %s4239_s19 }
 0x310   : > { %2429 = vrot.lane.b32.xlu1 %v4692_v27, %s4240_s26 }
 0x311   : > { %2427 = vrot.lane.b32.xlu0 %v4696_v32, %s4240_s26 }
 0x314   : > { %2651 = vrot.lane.b32.xlu1 %v4671_v20, %s4241_s23 }
 0x315   : > { %2647 = vrot.lane.b32.xlu0 %v4662_v11, %s4241_s23 }
 0x318   : > { %2861 = vrot.lane.b32.xlu1 %v4671_v20, %s4242_s27  ;;  %v5491_v20 = vmov 2  }
 0x319   : > { %2645 = vrot.lane.b32.xlu0 %v4665_v15, %s4241_s23 }
 0x31c   : > { %2857 = vrot.lane.b32.xlu1 %v4662_v11, %s4242_s27 }
 0x31d   : > { %2643 = vrot.lane.b32.xlu0 %v4647_v52, %s4241_s23 }
 0x320   : > { %2855 = vrot.lane.b32.xlu1 %v4665_v15, %s4242_s27  ;;  %v3423_v15 = vld [vmem:[%s5481_s5 + $0x98] sm:$0xff] }
 0x321   : > { %2649 = vrot.lane.b32.xlu0 %v4677_v56, %s4241_s23 }
 0x324   : > { %2859 = vrot.lane.b32.xlu1 %v4677_v56, %s4242_s27  ;;  %v3427_v56 = vld [vmem:[%s5481_s5 + $0xb8] sm:$0xff] }
 0x325   : > { %2641 = vrot.lane.b32.xlu0 %v4652_v4, %s4241_s23 }
 0x328   : > { %2853 = vrot.lane.b32.xlu1 %v4647_v52, %s4242_s27 }
 0x329   : > { %2639 = vrot.lane.b32.xlu0 %v4692_v27, %s4241_s23 }
 0x32c   : > { %2851 = vrot.lane.b32.xlu1 %v4652_v4, %s4242_s27 }
 0x32d   : > { %2637 = vrot.lane.b32.xlu0 %v4696_v32, %s4241_s23  ;;  %s5412_s23 = scalar_lea.vmem %s5483_s7, %s4179_s21 }
 0x330   : > { %2849 = vrot.lane.b32.xlu1 %v4692_v27, %s4242_s27  ;;  %v3453_v27 = vld [vmem:[%s5481_s5 + $0xc8] sm:$0xff] }
 0x331   : > { %2847 = vrot.lane.b32.xlu0 %v4696_v32, %s4242_s27  ;;  %v3454_v32 = vld [vmem:[%s5481_s5 + $0xd0] sm:$0xff] }
 0x334   : > { %3046 = vperm.xlu1 %4220, %v4830_v39  }
 0x335   : > { %3051 = vperm.xlu0 %4221, %v4853_v58  }
 0x338   : > { %3056 = vperm.xlu1 %4220, %v4836_v44  }
 0x339   : > { %3066 = vperm.xlu0 %4221, %v4865_v41  }
 0x33c   : > { %3061 = vperm.xlu1 %4220, %v4842_v46  }
 0x33d   : > { %3076 = vperm.xlu0 %4221, %v4872_v43  }
 0x340   : > { %3071 = vperm.xlu1 %4220, %v4848_v54  }
 0x341   : > { %3086 = vperm.xlu0 %4221, %v4884_v6  }
 0x344   : > { %3081 = vperm.xlu1 %4220, %v4860_v63  }
 0x345   : > { %v1654_v57 = vpop.permute.xlu1 %1653  ;;  %3096 = vperm.xlu0 %4221, %v4896_v50  }
 0x347   : > { %v1652_v40 = vpop.permute.xlu0 %1651 }
 0x348   : > { %3091 = vperm.xlu1 %4220, %v4877_v26  }
 0x349   : > { %4222 = vset.pattern.permute.xlu0 %v5490_v37 }
 0x34a   : > { %v1658_v10 = vpop.permute.xlu1 %1657  ;;  %3129 = vperm.xlu0 %4222, %v4830_v39  }
 0x34b   : > { %v1656_v47 = vpop.permute.xlu0 %1655 }
 0x34c   : > { %3101 = vperm.xlu1 %4220, %v4889_v12  }
 0x34e   : > { %v1662_v52 = vpop.permute.xlu1 %1661  ;;  %3141 = vperm.xlu0 %4222, %v4842_v46  }
 0x34f   : > { %3941 = vmatprep.subr.mxu0 %v1662_v52  ;;  %v1660_v59 = vpop.permute.xlu0 %1659 }
 0x350   : > { %3942 = vmatpush3.msra.mxu0 %v1662_v52  ;;  %4223 = vset.pattern.permute.xlu1 %v5490_v37  ;;  %v3501_v37 = vld [vmem:[%s5481_s5 + $0x188] sm:$0xff] }
 0x351   : > { %3943 = vmatprep.subr.mxu0 %v1660_v59  ;;  %3133 = vperm.xlu1 %4223, %v4853_v58  }
 0x352   : > { %3944 = vmatpush3.msra.mxu0 %v1660_v59  ;;  %v1650_v60 = vpop.permute.xlu1 %1649  ;;  %3149 = vperm.xlu0 %4222, %v4848_v54   ;;  %v3479_v59 = vld [vmem:[%s5481_s5 + $0x138] sm:$0xff] }
 0x353   : > { %3945 = vmatprep.subr.mxu0 %v1658_v10  ;;  %v1648_v62 = vpop.permute.xlu0 %1647 }
 0x354   : > { %3946 = vmatpush3.msra.mxu0 %v1658_v10  ;;  %v3478_v10 = vld [vmem:[%s5481_s5 + $0x130] sm:$0xff] }
 0x355   : > { %3947 = vmatprep.subr.mxu0 %v1656_v47  ;;  %3137 = vperm.xlu1 %4223, %v4836_v44  }
 0x356   : > { %3948 = vmatpush3.msra.mxu0 %v1656_v47  ;;  %v2022_v1 = vpop.permute.xlu1 %2021  ;;  %3157 = vperm.xlu0 %4222, %v4860_v63   ;;  %v3500_v47 = vld [vmem:[%s5481_s5 + $0x180] sm:$0xff] }
 0x357   : > { %3949 = vmatprep.subr.mxu0 %v1654_v57  ;;  %v2016_v2 = vpop.permute.xlu0 %2015 }
 0x358   : > { %3950 = vmatpush3.msra.mxu0 %v1654_v57  ;;  %v3463_v57 = vld [vmem:[%s5481_s5 + $0x118] sm:$0xff] }
 0x359   : > { %3951 = vmatprep.subr.mxu0 %v1652_v40  ;;  %3145 = vperm.xlu1 %4223, %v4865_v41  }
 0x35a   : > { %3952 = vmatpush3.msra.mxu0 %v1652_v40  ;;  %v2018_v3 = vpop.permute.xlu1 %2017  ;;  %3165 = vperm.xlu0 %4222, %v4877_v26  }
 0x35b   : > { %3953 = vmatprep.subr.mxu0 %v1650_v60  ;;  %v2012_v4 = vpop.permute.xlu0 %2011 }
 0x35c   : > { %3954 = vmatpush3.msra.mxu0 %v1650_v60 }
 0x35d   : > { %3955 = vmatprep.subr.mxu0 %v1648_v62  ;;  %3153 = vperm.xlu1 %4223, %v4872_v43  }
 0x35e   : > { %3956 = vmatpush3.msra.mxu0 %v1648_v62  ;;  %v2014_v8 = vpop.permute.xlu1 %2013  ;;  %3173 = vperm.xlu0 %4222, %v4889_v12   ;;  %v3480_v62 = vld [vmem:[%s5481_s5 + $0x140] sm:$0xff] }
 0x35f   : > { %3958 = vmatmul.mubr.msk.f32.vlgmr.msra.gmra.mxu0 %vm1671_vm1, %v3417_v5  ;;  %4009 = vmatprep.subr.mxu0 %v2022_v1  ;;  %v2008_v21 = vpop.permute.xlu0 %2007 }
 0x360   : > { %4010 = vmatpush3.msra.mxu0 %v2022_v1  ;;  %3960 = vmatprep.mubr.msk.f32.mxu0 %vm1671_vm1, %v3418_v7  ;;  %v3502_v1 = vld [vmem:[%s5481_s5 + $0x190] sm:$0xff] }
 0x361   : > { %3161 = vperm.xlu1 %4223, %v4884_v6   ;;  %v3482_v7 = vld [vmem:[%s5481_s5 + $0x150] sm:$0xff] }
 0x362   : > { %v2010_v9 = vpop.permute.xlu1 %2009  ;;  %4225 = vset.pattern.permute.xlu0 %v5491_v20 }
 0x363   : > { %3961 = vmatmul.mubr.msk.f32.gmra.mxu0 %vm1671_vm1, %v3419_v0  ;;  %v4925_v48 = vpop.permute.xlu0 %2227  ;;  %3193 = vperm.xlu0 %4225, %v4853_v58   ;;  %v3483_v0 = vld [vmem:[%s5481_s5 + $0x158] sm:$0xff] }
 0x364   : > { %3963 = vmatprep.mubr.msk.f32.mxu0 %vm1671_vm1, %v3420_v22  ;;  %v3505_v22 = vld [vmem:[%s5481_s5 + $0x1a8] sm:$0xff] }
 0x365   : > { %3169 = vperm.xlu1 %4223, %v4896_v50  }
 0x366   : > { %v2232_v11 = vpop.permute.xlu1 %2231 }
 0x367   : > { %3964 = vmatmul.mubr.msk.f32.gmra.mxu0 %vm1671_vm1, %v3421_v53  ;;  %4043 = vmatprep.subr.mxu1 %v2232_v11  ;;  %v2020_v45 = vpop.permute.xlu0 %2019 }
 0x368   : > { %4044 = vmatpush3.msra.mxu1 %v2232_v11  ;;  %4011 = vmatprep.subr.mxu0 %v2020_v45  ;;  %v3485_v11 = vld [vmem:[%s5481_s5 + $0x168] sm:$0xff] }
 0x369   : > { %3966 = vmatprep.mubr.msk.f32.mxu0 %vm1671_vm1, %v3422_v13  ;;  %4012 = vmatpush3.msra.mxu0 %v2020_v45  ;;  %v3507_v13 = vld [vmem:[%s5481_s5 + $0x1b8] sm:$0xff] }
 0x36a   : > { %v2442_v30 = vpop.permute.xlu1 %2441  ;;  %4013 = vmatprep.subr.mxu0 %v2018_v3  ;;  %4224 = vset.pattern.permute.xlu1 %v5491_v20  ;;  %v3487_v20 = vld [vmem:[%s5481_s5 + $0x178] sm:$0xff] }
 0x36b   : > { %3967 = vmatmul.mubr.msk.f32.gmra.mxu0 %vm1671_vm1, %v3423_v15  ;;  %v4946_v14 = vpop.permute.xlu0 %2225  ;;  %3189 = vperm.xlu1 %4224, %v4830_v39   ;;  %v3486_v15 = vld [vmem:[%s5481_s5 + $0x170] sm:$0xff] }
 0x36c   : > { %4014 = vmatpush3.msra.mxu0 %v2018_v3  ;;  %3969 = vmatprep.mubr.msk.f32.mxu0 %vm1671_vm1, %v3424_v16  ;;  %v3481_v3 = vld [vmem:[%s5481_s5 + $0x148] sm:$0xff]  ;;  %v3508_v16 = vld [vmem:[%s5481_s5 + $0x1c0] sm:$0xff] }
 0x36d   : > { %4015 = vmatprep.subr.mxu0 %v2016_v2  ;;  %3205 = vperm.xlu0 %4225, %v4865_v41  }
 0x36e   : > { %4016 = vmatpush3.msra.mxu0 %v2016_v2  ;;  %v2438_v18 = vpop.permute.xlu1 %2437 }
 0x36f   : > { %3970 = vmatmul.mubr.msk.f32.gmra.mxu0 %vm1671_vm1, %v3425_v42  ;;  %4017 = vmatprep.subr.mxu0 %v2014_v8  ;;  %v2224_v19 = vpop.permute.xlu0 %2223 }
 0x370   : > { %4018 = vmatpush3.msra.mxu0 %v2014_v8  ;;  %3972 = vmatprep.mubr.msk.f32.mxu0 %vm1671_vm1, %v3426_v17  ;;  %v3504_v8 = vld [vmem:[%s5481_s5 + $0x1a0] sm:$0xff]  ;;  %v3510_v17 = vld [vmem:[%s5481_s5 + $0x1d0] sm:$0xff] }
 0x371   : > { %4019 = vmatprep.subr.mxu0 %v2012_v4  ;;  %3197 = vperm.xlu1 %4224, %v4836_v44   ;;  %v3460_v44 = vld [vmem:[%s5481_s5 + $0x100] sm:$0xff] }
 0x372   : > { %4020 = vmatpush3.msra.mxu0 %v2012_v4  ;;  %v2436_v23 = vpop.permute.xlu1 %2435  ;;  %3213 = vperm.xlu0 %4225, %v4872_v43   ;;  %v3477_v43 = vld [vmem:[%s5481_s5 + $0x128] sm:$0xff]  ;;  %v3503_v4 = vld [vmem:[%s5481_s5 + $0x198] sm:$0xff] }
 0x373   : > { %3973 = vmatmul.mubr.msk.f32.gmra.mxu0 %vm1671_vm1, %v3427_v56  ;;  %4021 = vmatprep.subr.mxu0 %v2010_v9  ;;  %v2222_v34 = vpop.permute.xlu0 %2221  ;;  %v3525_v56 = vld [vmem:[%s5481_s5 + $0x1e8] sm:$0xff] }
 0x374   : > { %4022 = vmatpush3.msra.mxu0 %v2010_v9  ;;  %4025 = vmatprep.mubr.msk.f32.mxu0 %vm1671_vm1, %v3452_v61 }
 0x375   : > { %4023 = vmatprep.subr.mxu0 %v2008_v21  ;;  %3201 = vperm.xlu1 %4224, %v4842_v46  }
 0x376   : > { %4024 = vmatpush3.msra.mxu0 %v2008_v21  ;;  %v2434_v31 = vpop.permute.xlu1 %2433  ;;  %3221 = vperm.xlu0 %4225, %v4884_v6   ;;  %v3553_v6 = vld [vmem:[%s5481_s5 + $0x268] sm:$0xff] }
 0x377   : > { %4026 = vmatmul.mubr.msk.f32.vlgmr.msra.gmra.mxu0 %vm1671_vm1, %v3453_v27  ;;  %4077 = vmatprep.subr.mxu0 %v2442_v30  ;;  %v2220_v33 = vpop.permute.xlu0 %2219 }
 0x378   : > { %4078 = vmatpush3.msra.mxu0 %v2442_v30  ;;  %4028 = vmatprep.mubr.msk.f32.mxu0 %vm1671_vm1, %v3454_v32  ;;  %v3527_v32 = vld [vmem:[%s5481_s5 + $0x1f8] sm:$0xff] }
 0x379   : > { %3209 = vperm.xlu1 %4224, %v4848_v54   ;;  %v3461_v54 = vld [vmem:[%s5481_s5 + $0x108] sm:$0xff] }
 0x37a   : > { %v2432_v55 = vpop.permute.xlu1 %2431  ;;  %3229 = vperm.xlu0 %4225, %v4896_v50   ;;  %v3555_v50 = vld [vmem:[%s5481_s5 + $0x278] sm:$0xff] }
 0x37b   : > { %4029 = vmatmul.mubr.msk.f32.gmra.mxu0 %vm1671_vm1, %v3455_v49  ;;  %v2230_v24 = vpop.permute.xlu0 %2229  ;;  %v3550_v49 = vld [vmem:[%s5481_s5 + $0x250] sm:$0xff] }
 0x37c   : > { %4045 = vmatprep.subr.mxu1 %v2230_v24  ;;  %4031 = vmatprep.mubr.msk.f32.mxu0 %vm1671_vm1, %v3456_v51  ;;  %v3529_v51 = vld [vmem:[%s5481_s5 + $0x208] sm:$0xff] }
 0x37d   : > { %4046 = vmatpush3.msra.mxu1 %v2230_v24  ;;  %3217 = vperm.xlu1 %4224, %v4860_v63   ;;  %v3462_v63 = vld [vmem:[%s5481_s5 + $0x110] sm:$0xff]  ;;  %v3552_v24 = vld [vmem:[%s5481_s5 + $0x260] sm:$0xff] }
 0x37e   : > { %v2440_v28 = vpop.permute.xlu1 %2439  ;;  %4047 = vmatprep.subr.mxu1 %v4925_v48 }
 0x37f   : > { %4032 = vmatmul.mubr.msk.f32.gmra.mxu0 %vm1671_vm1, %v3457_v25  ;;  %4079 = vmatprep.subr.mxu0 %v2440_v28  ;;  %v2218_v29 = vpop.permute.xlu0 %2217  ;;  %v3531_v25 = vld [vmem:[%s5481_s5 + $0x218] sm:$0xff] }
 0x380   : > { %4048 = vmatpush3.msra.mxu1 %v4925_v48  ;;  %4080 = vmatpush3.msra.mxu0 %v2440_v28  ;;  %v3506_v48 = vld [vmem:[%s5481_s5 + $0x1b0] sm:$0xff]  ;;  %v3532_v28 = vld [vmem:[%s5481_s5 + $0x220] sm:$0xff] }
 0x381   : > { %4049 = vmatprep.subr.mxu1 %v4946_v14  ;;  %4081 = vmatprep.subr.mxu0 %v2438_v18 }
 0x382   : > { %4034 = vmatprep.mubr.msk.f32.mxu0 %vm1671_vm1, %v3458_v35  ;;  %4050 = vmatpush3.msra.mxu1 %v4946_v14  ;;  %v2430_v38 = vpop.permute.xlu1 %2429  ;;  %v3509_v14 = vld [vmem:[%s5481_s5 + $0x1c8] sm:$0xff] }
 0x383   : > { %4082 = vmatpush3.msra.mxu0 %v2438_v18  ;;  %4051 = vmatprep.subr.mxu1 %v2224_v19  ;;  %v2428_v39 = vpop.permute.xlu0 %2427  ;;  %v3524_v18 = vld [vmem:[%s5481_s5 + $0x1e0] sm:$0xff]  ;;  %v3533_v35 = vld [vmem:[%s5481_s5 + $0x228] sm:$0xff] }
 0x384   : > { %4035 = vmatmul.mubr.msk.f32.gmra.mxu0 %vm1671_vm1, %v3459_v36  ;;  %4083 = vmatprep.subr.mxu0 %v2436_v23  ;;  %v3534_v36 = vld [vmem:[%s5481_s5 + $0x230] sm:$0xff] }
 0x385   : > { %4052 = vmatpush3.msra.mxu1 %v2224_v19  ;;  %4084 = vmatpush3.msra.mxu0 %v2436_v23  ;;  %v3511_v19 = vld [vmem:[%s5481_s5 + $0x1d8] sm:$0xff]  ;;  %v3526_v23 = vld [vmem:[%s5481_s5 + $0x1f0] sm:$0xff] }
 0x386   : > { %4053 = vmatprep.subr.mxu1 %v2222_v34  ;;  %4085 = vmatprep.subr.mxu0 %v2434_v31  ;;  %v2652_v46 = vpop.permute.xlu1 %2651 }
 0x387   : > { %4037 = vmatprep.mubr.msk.f32.mxu0 %vm1671_vm1, %v3460_v44  ;;  %4054 = vmatpush3.msra.mxu1 %v2222_v34  ;;  %v2648_v58 = vpop.permute.xlu0 %2647  ;;  %v3548_v34 = vld [vmem:[%s5481_s5 + $0x240] sm:$0xff]  ;;  %v3557_v44 = vld [vmem:[%s5481_s5 + $0x288] sm:$0xff] }
 0x388   : > { %4086 = vmatpush3.msra.mxu0 %v2434_v31  ;;  %4055 = vmatprep.subr.mxu1 %v2220_v33  ;;  %v3549_v31 = vld [vmem:[%s5481_s5 + $0x248] sm:$0xff] }
 0x389   : > { %4038 = vmatmul.mubr.msk.f32.gmra.mxu0 %vm1671_vm1, %v3461_v54  ;;  %4087 = vmatprep.subr.mxu0 %v2432_v55  ;;  %v3559_v54 = vld [vmem:[%s5481_s5 + $0x298] sm:$0xff] }
 0x38a   : > { %4056 = vmatpush3.msra.mxu1 %v2220_v33  ;;  %4088 = vmatpush3.msra.mxu0 %v2432_v55  ;;  %v2862_v41 = vpop.permute.xlu1 %2861  ;;  %v3528_v33 = vld [vmem:[%s5481_s5 + $0x200] sm:$0xff]  ;;  %v3551_v55 = vld [vmem:[%s5481_s5 + $0x258] sm:$0xff] }
 0x38b   : > { %4057 = vmatprep.subr.mxu1 %v2218_v29  ;;  %4089 = vmatprep.subr.mxu0 %v2430_v38  ;;  %v2646_v40 = vpop.permute.xlu0 %2645 }
 0x38c   : > { %4040 = vmatprep.mubr.msk.f32.mxu0 %vm1671_vm1, %v3462_v63  ;;  %4058 = vmatpush3.msra.mxu1 %v2218_v29  ;;  %v3554_v29 = vld [vmem:[%s5481_s5 + $0x270] sm:$0xff] }
 0x38d   : > { %4090 = vmatpush3.msra.mxu0 %v2430_v38  ;;  %4060 = vmatmul.mubr.msk.f32.vlgmr.msra.gmra.mxu1 %vm1671_vm1, %v3477_v43  ;;  %v3556_v38 = vld [vmem:[%s5481_s5 + $0x280] sm:$0xff] }
 0x38e   : > { %4041 = vmatmul.mubr.msk.f32.gmra.mxu0 %vm1671_vm1, %v3463_v57  ;;  %4091 = vmatprep.subr.mxu0 %v2428_v39  ;;  %v2858_v52 = vpop.permute.xlu1 %2857 }
 0x38f   : > { %4111 = vmatprep.subr.mxu1 %v2652_v46  ;;  %4092 = vmatpush3.msra.mxu0 %v2428_v39  ;;  %v2644_v60 = vpop.permute.xlu0 %2643  ;;  %v3535_v39 = vld [vmem:[%s5481_s5 + $0x238] sm:$0xff] }
 0x390   : > { %4112 = vmatpush3.msra.mxu1 %v2652_v46  ;;  %4145 = vmatprep.subr.mxu0 %v2862_v41  ;;  %v3558_v46 = vld [vmem:[%s5481_s5 + $0x290] sm:$0xff] }
 0x391   : > { %4062 = vmatprep.mubr.msk.f32.mxu1 %vm1671_vm1, %v3478_v10  ;;  %4093 = vmatprep.mubr.msk.f32.mxu0 %vm1671_vm1, %v3500_v47 }
 0x392   : > { %4063 = vmatmul.mubr.msk.f32.gmra.mxu1 %vm1671_vm1, %v3479_v59  ;;  %4094 = vmatmul.mubr.msk.f32.vlgmr.msra.gmra.mxu0 %vm1671_vm1, %v3501_v37  ;;  %v2856_v2 = vpop.permute.xlu1 %2855 }
 0x393   : > { %4146 = vmatpush3.msra.mxu0 %v2862_v41  ;;  %4065 = vmatprep.mubr.msk.f32.mxu1 %vm1671_vm1, %v3480_v62  ;;  %v2650_v5 = vpop.permute.xlu0 %2649 }
 0x394   : > { %4096 = vmatprep.mubr.msk.f32.mxu0 %vm1671_vm1, %v3502_v1  ;;  %4113 = vmatprep.subr.mxu1 %v2650_v5 }
 0x395   : > { %4114 = vmatpush3.msra.mxu1 %v2650_v5  ;;  %3225 = vperm.xlu1 %4224, %v4877_v26   ;;  %v3484_v26 = vld [vmem:[%s5481_s5 + $0x160] sm:$0xff] }
 0x396   : > { %4066 = vmatmul.mubr.msk.f32.gmra.mxu1 %vm1671_vm1, %v3481_v3  ;;  %4097 = vmatmul.mubr.msk.f32.gmra.mxu0 %vm1671_vm1, %v3503_v4  ;;  %v2860_v21 = vpop.permute.xlu1 %2859 }
 0x397   : > { %4068 = vmatprep.mubr.msk.f32.mxu1 %vm1671_vm1, %v3482_v7  ;;  %4099 = vmatprep.mubr.msk.f32.mxu0 %vm1671_vm1, %v3504_v8  ;;  %v2642_v9 = vpop.permute.xlu0 %2641 }
 0x398   : > { %4115 = vmatprep.subr.mxu1 %v2648_v58  ;;  %4147 = vmatprep.subr.mxu0 %v2860_v21 }
 0x399   : > { %4116 = vmatpush3.msra.mxu1 %v2648_v58  ;;  %4148 = vmatpush3.msra.mxu0 %v2860_v21 }
 0x39a   : > { %4069 = vmatmul.mubr.msk.f32.gmra.mxu1 %vm1671_vm1, %v3483_v0  ;;  %4100 = vmatmul.mubr.msk.f32.gmra.mxu0 %vm1671_vm1, %v3505_v22  ;;  %v2854_v53 = vpop.permute.xlu1 %2853 }
 0x39b   : > { %4117 = vmatprep.subr.mxu1 %v2646_v40  ;;  %4149 = vmatprep.subr.mxu0 %v2858_v52  ;;  %v2640_v45 = vpop.permute.xlu0 %2639 }
 0x39c   : > { %4071 = vmatprep.mubr.msk.f32.mxu1 %vm1671_vm1, %v3484_v26  ;;  %4102 = vmatprep.mubr.msk.f32.mxu0 %vm1671_vm1, %v3506_v48 }
 0x39d   : > { %4118 = vmatpush3.msra.mxu1 %v2646_v40  ;;  %4150 = vmatpush3.msra.mxu0 %v2858_v52 }
 0x39e   : > { %4072 = vmatmul.mubr.msk.f32.gmra.mxu1 %vm1671_vm1, %v3485_v11  ;;  %4103 = vmatmul.mubr.msk.f32.gmra.mxu0 %vm1671_vm1, %v3507_v13  ;;  %v2852_v30 = vpop.permute.xlu1 %2851 }
 0x39f   : > { %4119 = vmatprep.subr.mxu1 %v2644_v60  ;;  %4151 = vmatprep.subr.mxu0 %v2856_v2  ;;  %v2638_v42 = vpop.permute.xlu0 %2637 }
 0x3a0   : > { %4120 = vmatpush3.msra.mxu1 %v2644_v60  ;;  %4152 = vmatpush3.msra.mxu0 %v2856_v2 }
 0x3a1   : > { %4121 = vmatprep.subr.mxu1 %v2642_v9  ;;  %4153 = vmatprep.subr.mxu0 %v2854_v53 }
 0x3a2   : > { %4074 = vmatprep.mubr.msk.f32.mxu1 %vm1671_vm1, %v3486_v15  ;;  %4105 = vmatprep.mubr.msk.f32.mxu0 %vm1671_vm1, %v3508_v16  ;;  %v2850_v61 = vpop.permute.xlu1 %2849 }
 0x3a3   : > { %4122 = vmatpush3.msra.mxu1 %v2642_v9  ;;  %4154 = vmatpush3.msra.mxu0 %v2854_v53  ;;  %v2848_v27 = vpop.permute.xlu0 %2847 }
 0x3a4   : > { %4075 = vmatmul.mubr.msk.f32.gmra.mxu1 %vm1671_vm1, %v3487_v20  ;;  %4106 = vmatmul.mubr.msk.f32.gmra.mxu0 %vm1671_vm1, %v3509_v14 }
 0x3a5   : > { %4123 = vmatprep.subr.mxu1 %v2640_v45  ;;  %4155 = vmatprep.subr.mxu0 %v2852_v30 }
 0x3a6   : > { %4124 = vmatpush3.msra.mxu1 %v2640_v45  ;;  %4156 = vmatpush3.msra.mxu0 %v2852_v30 }
 0x3a7   : > { %4125 = vmatprep.subr.mxu1 %v2638_v42  ;;  %4108 = vmatprep.mubr.msk.f32.mxu0 %vm1671_vm1, %v3510_v17 }
 0x3a8   : > { %4126 = vmatpush3.msra.mxu1 %v2638_v42  ;;  %4127 = vmatprep.mubr.msk.f32.mxu1 %vm1671_vm1, %v3524_v18 }
 0x3a9   : > { %4109 = vmatmul.mubr.msk.f32.gmra.mxu0 %vm1671_vm1, %v3511_v19  ;;  %4128 = vmatmul.mubr.msk.f32.vlgmr.msra.gmra.mxu1 %vm1671_vm1, %v3525_v56 }
 0x3aa   : > { %4157 = vmatprep.subr.mxu0 %v2850_v61  ;;  %4130 = vmatprep.mubr.msk.f32.mxu1 %vm1671_vm1, %v3526_v23 }
 0x3ab   : > { %4158 = vmatpush3.msra.mxu0 %v2850_v61  ;;  %4161 = vmatprep.mubr.msk.f32.mxu0 %vm1671_vm1, %v3548_v34  ;;  %v5217_v63 = vpop.f32.mrf.mxu1 }
 0x3ac   : > { %4159 = vmatprep.subr.mxu0 %v2848_v27  ;;  %3233 = vperm.xlu1 %4224, %v4889_v12   ;;  %v3530_v12 = vld [vmem:[%s5481_s5 + $0x210] sm:$0xff] }
 0x3ad   : > { %4160 = vmatpush3.msra.mxu0 %v2848_v27  ;;  %4131 = vmatmul.mubr.msk.f32.gmra.mxu1 %vm1671_vm1, %v3527_v32  ;;  %v5225_v40 = vpop.f32.mrf.mxu1 }
 0x3ae   : > { %4162 = vmatmul.mubr.msk.f32.vlgmr.msra.gmra.mxu0 %vm1671_vm1, %v3549_v31  ;;  %4133 = vmatprep.mubr.msk.f32.mxu1 %vm1671_vm1, %v3528_v33 }
 0x3af   : > { %4164 = vmatprep.mubr.msk.f32.mxu0 %vm1671_vm1, %v3550_v49  ;;  %v5215_v58 = vpop.permute.xlu1 %3046  ;;  %v5233_v59 = vpop.f32.mrf.mxu1 }
 0x3b0   : > { %v5259_v22 = vpop.permute.xlu0 %3051 }
 0x3b1   : > { %4134 = vmatmul.mubr.msk.f32.gmra.mxu1 %vm1671_vm1, %v3529_v51  ;;  %v5239_v62 = vpop.f32.mrf.mxu1 }
 0x3b2   : > { %4165 = vmatmul.mubr.msk.f32.gmra.mxu0 %vm1671_vm1, %v3551_v55  ;;  %4136 = vmatprep.mubr.msk.f32.mxu1 %vm1671_vm1, %v3530_v12 }
 0x3b3   : > { %4167 = vmatprep.mubr.msk.f32.mxu0 %vm1671_vm1, %v3552_v24  ;;  %v5221_v43 = vpop.permute.xlu1 %3056  ;;  %v5247_v4 = vpop.f32.mrf.mxu1 }
 0x3b4   : > { %5492 = vst [vmem:[#allocation2_spill] sm:$0xff] %v5221_v43  ;;  %v5267_v13 = vpop.permute.xlu0 %3066 }
 0x3b5   : > { %4137 = vmatmul.mubr.msk.f32.gmra.mxu1 %vm1671_vm1, %v3531_v25  ;;  %v5255_v21 = vpop.f32.mrf.mxu1  ;;  %5496 = vst [vmem:[#allocation6_spill] sm:$0xff] %v5267_v13 }
 0x3b6   : > { %4168 = vmatmul.mubr.msk.f32.gmra.mxu0 %vm1671_vm1, %v3553_v6  ;;  %4139 = vmatprep.mubr.msk.f32.mxu1 %vm1671_vm1, %v3532_v28 }
 0x3b7   : > { %4170 = vmatprep.mubr.msk.f32.mxu0 %vm1671_vm1, %v3554_v29  ;;  %v5231_v52 = vpop.permute.xlu1 %3061  ;;  %v5263_v26 = vpop.f32.mrf.mxu1 }
 0x3b8   : > { %v5279_v42 = vpop.permute.xlu0 %3076 }
 0x3b9   : > { %4140 = vmatmul.mubr.msk.f32.gmra.mxu1 %vm1671_vm1, %v3533_v35  ;;  %v5269_v45 = vpop.f32.mrf.mxu1  ;;  %5498 = vst [vmem:[#allocation8_spill] sm:$0xff] %v5279_v42 }
 0x3ba   : > { %4171 = vmatmul.mubr.msk.f32.gmra.mxu0 %vm1671_vm1, %v3555_v50  ;;  %4142 = vmatprep.mubr.msk.f32.mxu1 %vm1671_vm1, %v3534_v36 }
 0x3bb   : > { %4173 = vmatprep.mubr.msk.f32.mxu0 %vm1671_vm1, %v3556_v38  ;;  %v5243_v2 = vpop.permute.xlu1 %3071  ;;  %v5275_v20 = vpop.f32.mrf.mxu1 }
 0x3bc   : > { %5493 = vst [vmem:[#allocation3_spill] sm:$0xff] %v5243_v2  ;;  %v5289_v61 = vpop.permute.xlu0 %3086 }
 0x3bd   : > { %4143 = vmatmul.mubr.msk.f32.gmra.mxu1 %vm1671_vm1, %v3535_v39  ;;  %v5285_v19 = vpop.f32.mrf.mxu1  ;;  %5499 = vst [vmem:[#allocation9_spill] sm:$0xff] %v5289_v61 }
 0x3be   : > { %4174 = vmatmul.mubr.msk.f32.gmra.mxu0 %vm1671_vm1, %v3557_v44 }
 0x3bf   : > { %4176 = vmatprep.mubr.msk.f32.mxu0 %vm1671_vm1, %v3558_v46  ;;  %v5253_v8 = vpop.permute.xlu1 %3081  ;;  %v5291_v23 = vpop.f32.mrf.mxu1 }
 0x3c0   : > { %5494 = vst [vmem:[#allocation4_spill] sm:$0xff] %v5253_v8  ;;  %v5303_v49 = vpop.permute.xlu0 %3096 }
 0x3c1   : > { %v5299_v31 = vpop.f32.mrf.mxu1  ;;  %5501 = vst [vmem:[#allocation11_spill] sm:$0xff] %v5303_v49 }
 0x3c2   : > { %4177 = vmatmul.mubr.msk.f32.gmra.mxu0 %vm1671_vm1, %v3559_v54 }
 0x3c3   : > { %v5265_v53 = vpop.permute.xlu1 %3091 }
 0x3c4   : > { %5495 = vst [vmem:[#allocation5_spill] sm:$0xff] %v5265_v53 }
 0x3c5   : > { %v5311_v6 = vpop.permute.xlu0 %3129 }
 0x3c6   : > { %5504 = vst [vmem:[#allocation14_spill] sm:$0xff] %v5311_v6 }
 0x3c7   : > { %v5273_v30 = vpop.permute.xlu1 %3101 }
 0x3c8   : > { %5497 = vst [vmem:[#allocation7_spill] sm:$0xff] %v5273_v30 }
 0x3c9   : > { %v5317_v44 = vpop.permute.xlu0 %3141 }
 0x3ca   : > { %5506 = vst [vmem:[#allocation16_spill] sm:$0xff] %v5317_v44 }
 0x3cc   : > { %v5283_v18 = vpop.permute.xlu1 %3133 }
 0x3d0   : > { %v5295_v27 = vpop.permute.xlu1 %3137 }
 0x3d1   : > { %5500 = vst [vmem:[#allocation10_spill] sm:$0xff] %v5295_v27 }
 0x3d4   : > { %v5305_v55 = vpop.permute.xlu1 %3145 }
 0x3d5   : > { %5502 = vst [vmem:[#allocation12_spill] sm:$0xff] %v5305_v55 }
 0x3d8   : > { %v5313_v35 = vpop.permute.xlu1 %3153 }
 0x3d9   : > { %5505 = vst [vmem:[#allocation15_spill] sm:$0xff] %v5313_v35  ;;  %v5331_v35 = vpop.permute.xlu0 %3149 }
 0x3da   : > { %5509 = vst [vmem:[#allocation19_spill] sm:$0xff] %v5331_v35 }
 0x3dc   : > { %v5321_v49 = vpop.permute.xlu1 %3161 }
 0x3dd   : > { %5507 = vst [vmem:[#allocation17_spill] sm:$0xff] %v5321_v49  ;;  %v5343_v49 = vpop.permute.xlu0 %3157 }
 0x3de   : > { %5515 = vst [vmem:[#allocation25_spill] sm:$0xff] %v5343_v49 }
 0x3e0   : > { %v5337_v13 = vpop.permute.xlu1 %3169 }
 0x3e1   : > { %5512 = vst [vmem:[#allocation22_spill] sm:$0xff] %v5337_v13 }
 0x3e6   : > { %v5351_v35 = vpop.permute.xlu1 %3189 }
 0x3e7   : > { %5518 = vst [vmem:[#allocation28_spill] sm:$0xff] %v5351_v35 }
 0x41f   : > { %v5219_v41 = vpop.f32.mrf.mxu0 }
 0x420   : > { %v1941_v43 = vadd.f32 %v5217_v63, %v5219_v41 }
 0x421   : > { %v5223_v57 = vpop.f32.mrf.mxu0 }
 0x422   : > { %v1936_v13 = vadd.f32 %v5225_v40, %v5223_v57 }
 0x423   : > { %v5227_v10 = vpop.f32.mrf.mxu0 }
 0x424   : > { %v1951_v49 = vadd.f32 %v5233_v59, %v5227_v10 }
 0x425   : > { %v5229_v47 = vpop.f32.mrf.mxu0 }
 0x426   : > { %v1946_v63 = vadd.f32 %v5239_v62, %v5229_v47 }
 0x427   : > { %v5235_v37 = vpop.f32.mrf.mxu0 }
 0x429   : > { %v5237_v60 = vpop.f32.mrf.mxu0 }
 0x42a   : > { %v1956_v40 = vadd.f32 %v5255_v21, %v5237_v60 }
 0x42b   : > { %v5241_v1 = vpop.f32.mrf.mxu0 }
 0x42c   : > { %v1971_v10 = vadd.f32 %v5263_v26, %v5241_v1 }
 0x42d   : > { %v5245_v3 = vpop.f32.mrf.mxu0 }
 0x42e   : > { %v1966_v59 = vadd.f32 %v5269_v45, %v5245_v3 }
 0x42f   : > { %v5249_v5 = vpop.f32.mrf.mxu0 }
 0x431   : > { %v5251_v7 = vpop.f32.mrf.mxu0 }
 0x432   : > { %v1976_v60 = vadd.f32 %v5285_v19, %v5251_v7 }
 0x433   : > { %v5257_v0 = vpop.f32.mrf.mxu0 }
 0x434   : > { %v1991_v1 = vadd.f32 %v5291_v23, %v5257_v0 }
 0x435   : > { %v5261_v9 = vpop.f32.mrf.mxu0 }
 0x436   : > { %v5388_v3 = vadd.f32 %v5299_v31, %v5261_v9 }
 0x437   : > { %v4027_v48 = vpop.f32.mrf.mxu0 }
 0x439   : > { %v2133_v11 = vpop.f32.mrf.mxu0 }
 0x43b   : > { %v4030_v15 = vpop.f32.mrf.mxu0 }
 0x43c   : > { %v2195_v41 = vadd.f32 %v4030_v15, %v1951_v49 }
 0x43d   : > { %v5271_v16 = vpop.f32.mrf.mxu0 }
 0x43e   : > { %v2194_v47 = vadd.f32 %v5271_v16, %v1946_v63 }
 0x43f   : > { %v5277_v14 = vpop.f32.mrf.mxu0 }
 0x441   : > { %v5281_v17 = vpop.f32.mrf.mxu0 }
 0x444   : > { %v5287_v56 = vpop.f32.mrf.mxu0 }
 0x445   : > { %v2199_v7 = vadd.f32 %v5287_v56, %v1971_v10 }
 0x446   : > { %v5293_v34 = vpop.f32.mrf.mxu0 }
 0x447   : > { %v2198_v0 = vadd.f32 %v5293_v34, %v1966_v59 }
 0x449   : > { %v5297_v32 = vpop.f32.mrf.mxu0 }
 0x44b   : > { %v5301_v33 = vpop.f32.mrf.mxu0 }
 0x44d   : > { %v4061_v51 = vpop.f32.mrf.mxu1 }
 0x44e   : > { %v5307_v12 = vpop.f32.mrf.mxu0 }
 0x44f   : > { %v2343_v24 = vpop.f32.mrf.mxu1 }
 0x450   : > { %v5309_v25 = vpop.f32.mrf.mxu0 }
 0x451   : > { %5503 = vst [vmem:[#allocation13_spill] sm:$0xff] %v5309_v25 }
 0x452   : > { %v4064_v28 = vpop.f32.mrf.mxu1  ;;  %v4095_v29 = vpop.f32.mrf.mxu0 }
 0x453   : > { %v2405_v62 = vadd.f32 %v4064_v28, %v2195_v41 }
 0x454   : > { %v2353_v50 = vpop.f32.mrf.mxu1  ;;  %v2553_v36 = vpop.f32.mrf.mxu0 }
 0x455   : > { %v2404_v21 = vadd.f32 %v2353_v50, %v2194_v47 }
 0x456   : > { %v5315_v38 = vpop.f32.mrf.mxu1  ;;  %v4098_v39 = vpop.f32.mrf.mxu0 }
 0x457   : > { %v2615_v26 = vadd.f32 %v4098_v39, %v2405_v62 }
 0x458   : > { %v5319_v46 = vpop.f32.mrf.mxu1  ;;  %v2563_v54 = vpop.f32.mrf.mxu0 }
 0x459   : > { %v2614_v23 = vadd.f32 %v2563_v54, %v2404_v21 }
 0x45a   : > { %v5323_v30 = vpop.f32.mrf.mxu1  ;;  %v5325_v61 = vpop.f32.mrf.mxu0 }
 0x45c   : > { %v5327_v53 = vpop.f32.mrf.mxu1  ;;  %v5329_v42 = vpop.f32.mrf.mxu0 }
 0x45d   : > { %5508 = vst [vmem:[#allocation18_spill] sm:$0xff] %v5327_v53  ;;  %v5363_v53 = vpop.permute.xlu0 %3165 }
 0x45e   : > { %v5333_v55 = vpop.f32.mrf.mxu1  ;;  %v5335_v8 = vpop.f32.mrf.mxu0 }
 0x45f   : > { %5510 = vst [vmem:[#allocation20_spill] sm:$0xff] %v5333_v55  ;;  %5511 = vst [vmem:[#allocation21_spill] sm:$0xff] %v5335_v8 }
 0x460   : > { %v5339_v27 = vpop.f32.mrf.mxu1  ;;  %v5341_v2 = vpop.f32.mrf.mxu0 }
 0x461   : > { %5513 = vst [vmem:[#allocation23_spill] sm:$0xff] %v5339_v27  ;;  %5514 = vst [vmem:[#allocation24_spill] sm:$0xff] %v5341_v2  ;;  %v2193_v27 = vadd.f32 %v4027_v48, %v1941_v43  ;;  %v2192_v2 = vadd.f32 %v2133_v11, %v1936_v13  ;;  %v1961_v43 = vadd.f32 %v5247_v4, %v5235_v37  ;;  %v5377_v48 = vpop.permute.xlu1 %3197  ;;  %v5394_v19 = vpop.permute.xlu0 %3173 }
 0x462   : > { %v1981_v37 = vadd.f32 %v5275_v20, %v5249_v5  ;;  %v2196_v20 = vadd.f32 %v5281_v17, %v1956_v40  ;;  %v5523_v40 = vld [vmem:[#allocation14_spill] sm:$0xff] }
 0x463   : > { %v2197_v5 = vadd.f32 %v5277_v14, %v1961_v43  ;;  %v2200_v14 = vadd.f32 %v5301_v33, %v1976_v60 }
 0x464   : > { %v5345_v25 = vpop.f32.mrf.mxu1  ;;  %v5347_v44 = vpop.f32.mrf.mxu0  ;;  %v2406_v56 = vadd.f32 %v5319_v46, %v2196_v20 }
 0x465   : > { %5516 = vst [vmem:[#allocation26_spill] sm:$0xff] %v5345_v25  ;;  %5517 = vst [vmem:[#allocation27_spill] sm:$0xff] %v5347_v44  ;;  %v2403_v25 = vadd.f32 %v4061_v51, %v2193_v27  ;;  %v2407_v17 = vadd.f32 %v5315_v38, %v2197_v5  ;;  %v3194_v39 = vpop.permute.xlu0 %3193 }
 0x466   : > { %v5353_v55 = vpop.f32.mrf.mxu1  ;;  %v5355_v6 = vpop.f32.mrf.mxu0  ;;  %v2616_v33 = vadd.f32 %v5329_v42, %v2406_v56 }
 0x467   : > { %5519 = vst [vmem:[#allocation29_spill] sm:$0xff] %v5353_v55  ;;  %5520 = vst [vmem:[#allocation30_spill] sm:$0xff] %v5355_v6  ;;  %v2402_v55 = vadd.f32 %v2343_v24, %v2192_v2  ;;  %v2613_v6 = vadd.f32 %v4095_v29, %v2403_v25  ;;  %v3202_v24 = vpop.permute.xlu1 %3201 }
 0x469   : > { %v5361_v8 = vpop.f32.mrf.mxu0  ;;  %v4129_v44 = vpop.f32.mrf.mxu1  ;;  %v2612_v2 = vadd.f32 %v2553_v36, %v2402_v55  ;;  %v2201_v55 = vadd.f32 %v5297_v32, %v1981_v37  ;;  %v2409_v36 = vadd.f32 %v5323_v30, %v2199_v7  ;;  %v2617_v32 = vadd.f32 %v5325_v61, %v2407_v17 }
 0x46a   : > { %v2823_v11 = vadd.f32 %v4129_v44, %v2613_v6 }
 0x46b   : > { %v5367_v35 = vpop.f32.mrf.mxu0  ;;  %v2763_v57 = vpop.f32.mrf.mxu1 }
 0x46c   : > { %v2822_v45 = vadd.f32 %v2763_v57, %v2612_v2  ;;  %v5525_v2 = vld [vmem:[#allocation20_spill] sm:$0xff]  ;;  %v3210_v60 = vpop.permute.xlu1 %3209 }
 0x46d   : > { %v4132_v13 = vpop.f32.mrf.mxu1 }
 0x46e   : > { %v4163_v4 = vpop.f32.mrf.mxu0  ;;  %v2825_v27 = vadd.f32 %v4132_v13, %v2615_v26  ;;  %v5526_v13 = vld [vmem:[#allocation24_spill] sm:$0xff] }
 0x46f   : > { %v3033_v15 = vadd.f32 %v4163_v4, %v2823_v11  ;;  %v2773_v16 = vpop.f32.mrf.mxu1  ;;  %v2411_v11 = vadd.f32 %v5525_v2, %v2201_v55  ;;  %v5527_v26 = vld [vmem:[#allocation28_spill] sm:$0xff] }
 0x470   : > { %v2973_v9 = vpop.f32.mrf.mxu0  ;;  %v2824_v6 = vadd.f32 %v2773_v16, %v2614_v23  ;;  %v5530_v23 = vld [vmem:[#allocation27_spill] sm:$0xff] }
 0x471   : > { %v3105_v31 = vadd.f32 %v5259_v22, %v3033_v15  ;;  %v3032_v49 = vadd.f32 %v2973_v9, %v2822_v45  ;;  %v4135_v51 = vpop.f32.mrf.mxu1  ;;  %v2203_v22 = vadd.f32 %v5307_v12, %v1991_v1  ;;  %v5522_v12 = vld [vmem:[#allocation21_spill] sm:$0xff]  ;;  %v5528_v15 = vld [vmem:[#allocation16_spill] sm:$0xff] }
 0x472   : > { %v4166_v34 = vpop.f32.mrf.mxu0  ;;  %v2619_v61 = vadd.f32 %v5522_v12, %v2409_v36  ;;  %v2827_v57 = vadd.f32 %v4135_v51, %v2617_v32  ;;  %v3206_v51 = vpop.permute.xlu0 %3205  ;;  %v5534_v36 = vld [vmem:[#allocation23_spill] sm:$0xff] }
 0x473   : > { %v3117_v25 = vmax.f32 %v3105_v31, 0.0  ;;  %v3104_v28 = vadd.f32 %v5215_v58, %v3032_v49  ;;  %v3035_v29 = vadd.f32 %v4166_v34, %v2825_v27  ;;  %v2783_v50 = vpop.f32.mrf.mxu1  ;;  %v5521_v58 = vld [vmem:[#allocation18_spill] sm:$0xff]  ;;  %v2621_v27 = vadd.f32 %v5530_v23, %v2411_v11  ;;  %v5531_v31 = vld [vmem:[#allocation3_spill] sm:$0xff] }
 0x474   : > { %v2983_v38 = vpop.f32.mrf.mxu0  ;;  %v2408_v30 = vadd.f32 %v5521_v58, %v2198_v0  ;;  %v2826_v42 = vadd.f32 %v2783_v50, %v2616_v33  ;;  %v5529_v0 = vld [vmem:[#allocation13_spill] sm:$0xff]  ;;  %v5532_v34 = vld [vmem:[#allocation10_spill] sm:$0xff]  ;;  %v2410_v32 = vadd.f32 %v5534_v36, %v2200_v14  ;;  %v5547_v36 = vld [vmem:[#allocation11_spill] sm:$0xff] }
 0x475   : > { %v3116_v44 = vmax.f32 %v3104_v28, 0.0  ;;  %v3107_v46 = vadd.f32 %v5231_v52, %v3035_v29  ;;  %v3177_v54 = vmul.f32 %v5283_v18, %v3117_v25  ;;  %v3034_v63 = vadd.f32 %v2983_v38, %v2824_v6  ;;  %v4138_v41 = vpop.f32.mrf.mxu1  ;;  %v5524_v18 = vld [vmem:[#allocation2_spill] sm:$0xff] }
 0x476   : > { %v4169_v43 = vpop.f32.mrf.mxu0  ;;  %v2618_v37 = vadd.f32 %v5526_v13, %v2408_v30  ;;  %v2829_v1 = vadd.f32 %v4138_v41, %v2619_v61  ;;  %v2202_v9 = vadd.f32 %v5529_v0, %v5388_v3  ;;  %v5533_v6 = vld [vmem:[#allocation6_spill] sm:$0xff]  ;;  %v5537_v30 = vld [vmem:[#allocation29_spill] sm:$0xff]  ;;  %v3214_v13 = vpop.permute.xlu0 %3213 }
 0x477   : > { %v3176_v10 = vmul.f32 %v5523_v40, %v3116_v44  ;;  %v3119_v52 = vmax.f32 %v3107_v46, 0.0  ;;  %v3237_v59 = vadd.f32 %v3194_v39, %v3177_v54  ;;  %v3106_v47 = vadd.f32 %v5524_v18, %v3034_v63  ;;  %v2793_v62 = vpop.f32.mrf.mxu1  ;;  %v5535_v3 = vld [vmem:[#allocation26_spill] sm:$0xff] }
 0x478   : > { %v3037_v4 = vadd.f32 %v4169_v43, %v2827_v57  ;;  %v2993_v21 = vpop.f32.mrf.mxu0  ;;  %v2828_v55 = vadd.f32 %v2793_v62, %v2618_v37  ;;  %v2413_v33 = vadd.f32 %v5535_v3, %v2203_v22  ;;  %v2412_v12 = vadd.f32 %v5537_v30, %v2202_v9  ;;  %v5538_v61 = vld [vmem:[#allocation30_spill] sm:$0xff]  ;;  %v3218_v22 = vpop.permute.xlu1 %3217  ;;  %v5548_v3 = vld [vmem:[#allocation17_spill] sm:$0xff] }
 0x479   : > { %v3236_v45 = vadd.f32 %v5527_v26, %v3176_v10  ;;  %v3179_v16 = vmul.f32 %v5528_v15, %v3119_v52  ;;  %3250 = vst.msk [vmem:[%s5412_s23 + $0x8] sm:$0xff] %vm3248_vm2, %v3237_v59  ;;  %v3118_v5 = vmax.f32 %v3106_v47, 0.0  ;;  %v3036_v20 = vadd.f32 %v2993_v21, %v2826_v42  ;;  %v4141_v7 = vpop.f32.mrf.mxu1  ;;  %v5539_v42 = vld [vmem:[#allocation19_spill] sm:$0xff]  ;;  %v5540_v10 = vld [vmem:[#allocation12_spill] sm:$0xff]  ;;  %v5542_v21 = vld [vmem:[#allocation25_spill] sm:$0xff] }
 0x47a   : > { %v3109_v49 = vadd.f32 %v5531_v31, %v3037_v4  ;;  %v4172_v17 = vpop.f32.mrf.mxu0  ;;  %v2831_v38 = vadd.f32 %v4141_v7, %v2621_v27  ;;  %v2620_v57 = vadd.f32 %v5538_v61, %v2410_v32  ;;  %v2623_v14 = vadd.f32 %v5361_v8, %v2413_v33  ;;  %v5541_v59 = vld [vmem:[#allocation8_spill] sm:$0xff]  ;;  %v5543_v15 = vld [vmem:[#allocation5_spill] sm:$0xff] }
 0x47b   : > { %3249 = vst.msk [vmem:[%s5412_s23] sm:$0xff] %vm3248_vm2, %v3236_v45  ;;  %v3239_v56 = vadd.f32 %v3202_v24, %v3179_v16  ;;  %v3178_v25 = vmul.f32 %v5532_v34, %v3118_v5  ;;  %v3108_v28 = vadd.f32 %v5533_v6, %v3036_v20  ;;  %v3039_v29 = vadd.f32 %v4172_v17, %v2829_v1  ;;  %v2803_v50 = vpop.f32.mrf.mxu1  ;;  %v5536_v24 = vld [vmem:[#allocation4_spill] sm:$0xff]  ;;  %v5545_v31 = vld [vmem:[#allocation9_spill] sm:$0xff]  ;;  %v3222_v6 = vpop.permute.xlu0 %3221 }
 0x47c   : > { %v3121_v39 = vmax.f32 %v3109_v49, 0.0  ;;  %v3003_v44 = vpop.f32.mrf.mxu0  ;;  %v2622_v2 = vadd.f32 %v5367_v35, %v2412_v12  ;;  %v2830_v8 = vadd.f32 %v2803_v50, %v2620_v57  ;;  %v3226_v27 = vpop.permute.xlu1 %3225 }
 0x47d   : > { %3252 = vst.msk [vmem:[%s5412_s23 + $0x18] sm:$0xff] %vm3248_vm2, %v3239_v56  ;;  %v3238_v46 = vadd.f32 %v5377_v48, %v3178_v25  ;;  %v3120_v54 = vmax.f32 %v3108_v28, 0.0  ;;  %v3111_v63 = vadd.f32 %v5536_v24, %v3039_v29  ;;  %v3038_v41 = vadd.f32 %v3003_v44, %v2828_v55  ;;  %v4144_v58 = vpop.f32.mrf.mxu1  ;;  %v5546_v56 = vld [vmem:[#allocation7_spill] sm:$0xff] }
 0x47e   : > { %v3181_v43 = vmul.f32 %v5539_v42, %v3121_v39  ;;  %v4175_v40 = vpop.f32.mrf.mxu0  ;;  %v2833_v37 = vadd.f32 %v4144_v58, %v2623_v14 }
 0x47f   : > { %3251 = vst.msk [vmem:[%s5412_s23 + $0x10] sm:$0xff] %vm3248_vm2, %v3238_v46  ;;  %v3180_v48 = vmul.f32 %v5540_v10, %v3120_v54  ;;  %v3123_v52 = vmax.f32 %v3111_v63, 0.0  ;;  %v3110_v18 = vadd.f32 %v5541_v59, %v3038_v41  ;;  %v3041_v47 = vadd.f32 %v4175_v40, %v2831_v38  ;;  %v2813_v62 = vpop.f32.mrf.mxu1  ;;  %v5549_v54 = vld [vmem:[#allocation22_spill] sm:$0xff]  ;;  %v3230_v63 = vpop.permute.xlu0 %3229 }
 0x480   : > { %v3241_v11 = vadd.f32 %v3210_v60, %v3181_v43  ;;  %v3013_v1 = vpop.f32.mrf.mxu0  ;;  %v2832_v5 = vadd.f32 %v2813_v62, %v2622_v2  ;;  %v5544_v60 = vld [vmem:[#allocation15_spill] sm:$0xff]  ;;  %v3234_v38 = vpop.permute.xlu1 %3233 }
 0x481   : > { %v3240_v4 = vadd.f32 %v3206_v51, %v3180_v48  ;;  %v3183_v26 = vmul.f32 %v5542_v21, %v3123_v52  ;;  %v3122_v45 = vmax.f32 %v3110_v18, 0.0  ;;  %v3113_v16 = vadd.f32 %v5543_v15, %v3041_v47 }
 0x482   : > { %3254 = vst.msk [vmem:[%s5412_s23 + $0x28] sm:$0xff] %vm3248_vm2, %v3241_v11  ;;  %v3040_v20 = vadd.f32 %v3013_v1, %v2830_v8  ;;  %v4178_v7 = vpop.f32.mrf.mxu0 }
 0x483   : > { %3253 = vst.msk [vmem:[%s5412_s23 + $0x20] sm:$0xff] %vm3248_vm2, %v3240_v4  ;;  %v3243_v35 = vadd.f32 %v3218_v22, %v3183_v26  ;;  %v3182_v0 = vmul.f32 %v5544_v60, %v3122_v45  ;;  %v3125_v9 = vmax.f32 %v3113_v16, 0.0  ;;  %v3043_v23 = vadd.f32 %v4178_v7, %v2833_v37 }
 0x484   : > { %v3112_v49 = vadd.f32 %v5545_v31, %v3040_v20  ;;  %v3023_v51 = vpop.f32.mrf.mxu0 }
 0x485   : > { %3256 = vst.msk [vmem:[%s5412_s23 + $0x38] sm:$0xff] %vm3248_vm2, %v3243_v35  ;;  %v3242_v55 = vadd.f32 %v3214_v13, %v3182_v0  ;;  %v3185_v17 = vmul.f32 %v5363_v53, %v3125_v9  ;;  %v3115_v34 = vadd.f32 %v5546_v56, %v3043_v23  ;;  %v3042_v25 = vadd.f32 %v3023_v51, %v2832_v5 }
 0x486   : > { %v3124_v28 = vmax.f32 %v3112_v49, 0.0 }
 0x487   : > { %3255 = vst.msk [vmem:[%s5412_s23 + $0x30] sm:$0xff] %vm3248_vm2, %v3242_v55  ;;  %v3245_v29 = vadd.f32 %v3226_v27, %v3185_v17  ;;  %v3127_v50 = vmax.f32 %v3115_v34, 0.0  ;;  %v3114_v32 = vadd.f32 %v5547_v36, %v3042_v25 }
 0x488   : > { %v3184_v33 = vmul.f32 %v5548_v3, %v3124_v28 }
 0x489   : > { %3258 = vst.msk [vmem:[%s5412_s23 + $0x48] sm:$0xff] %vm3248_vm2, %v3245_v29  ;;  %v3187_v53 = vmul.f32 %v5394_v19, %v3127_v50  ;;  %v3126_v39 = vmax.f32 %v3114_v32, 0.0 }
 0x48a   : > { %v3244_v44 = vadd.f32 %v3222_v6, %v3184_v33 }
 0x48b   : > { %v3247_v46 = vadd.f32 %v3234_v38, %v3187_v53  ;;  %v3186_v24 = vmul.f32 %v5549_v54, %v3126_v39 }
 0x48c   : > { %3257 = vst.msk [vmem:[%s5412_s23 + $0x40] sm:$0xff] %vm3248_vm2, %v3244_v44 }
 0x48d   : > { %3260 = vst.msk [vmem:[%s5412_s23 + $0x58] sm:$0xff] %vm3248_vm2, %v3247_v46  ;;  %v3246_v41 = vadd.f32 %v3230_v63, %v3186_v24 }
 0x48f   : > { %3259 = vst.msk [vmem:[%s5412_s23 + $0x50] sm:$0xff] %vm3248_vm2, %v3246_v41 }
 0x490 PF: > { %s17_s24 = sadd.s32 1, %s4232_s24  }
 0x491   : > { %p14_p4 = scmp.ge.s32.totalorder %s17_s24, 4  }
 0x493   :  { %16 = sbr.rel (!%p14_p4) target bundleno = 1 (0x1), region = 90 }

</bundles_post_ra>
